<compile_context>
chip_gen: v6e
topology: v6e:2x2x1
jax: 0.10.0
libtpu: 0.0.40
codegen_flags: <defaults>
</compile_context>

<pallas_src>
import functools
import math
import string

import numpy as np

import jax
import jax.numpy as jnp
from jax import lax
from jax.experimental import pallas as pl
from jax.experimental.pallas import tpu as pltpu

VMEM_SPEC = pl.BlockSpec(memory_space=pltpu.MemorySpace.VMEM)


# --------------------------------------------------------------------------------
# Fused kernel:
#   x_ref:     (T*Bp, D)  bf16, time-major interpolated char embeddings (padded batch)
#   w_enc_ref: (D, C) bf16,  b_enc_ref: (1, C) f32        char encoder Linear+ReLU
#   w_ih_ref:  (C, 8H) bf16, b_ih_ref: (1, 8H) f32        [fwd i,f,g,o | bwd i,f,g,o]
#   whf_ref / whb_ref: (H, 4H) bf16                       fused per-direction W_hh
#   w_out1_ref / w_out2_ref: (H, O) bf16, b_out_ref: (1, O) f32
#   o_ref:     (T, Bp, O) f32 output
#   gx_ref:    (T*Bp, 8H) f32 scratch (hoisted gate pre-activations)
#   acc_ref:   (T, Bp, O) f32 scratch (backward-direction output partials)
# --------------------------------------------------------------------------------
def word_embedding_kernel(x_ref, w_enc_ref, b_enc_ref, w_ih_ref, b_ih_ref,
                          whf_ref, whb_ref, w_out1_ref, w_out2_ref, b_out_ref,
                          o_ref, gx_ref, acc_ref):
    T, Bp, O = o_ref.shape
    H = whf_ref.shape[0]

    # ---- char encoder (Linear + ReLU): one lane-dense MXU pass over T*Bp rows.
    cv = jnp.maximum(
        jnp.dot(x_ref[...], w_enc_ref[...], preferred_element_type=jnp.float32)
        + b_enc_ref[...],
        0.0)

    # ---- hoisted input->hidden projection for BOTH directions at once:
    #      (T*Bp, C) @ (C, 8H) + bias, 8H = 256 lanes -> lane-dense store.
    gx_ref[...] = (jnp.dot(cv.astype(jnp.bfloat16), w_ih_ref[...],
                           preferred_element_type=jnp.float32) + b_ih_ref[...])

    # Loop-invariant weight loads hoisted out of the recurrence.
    whf = whf_ref[...]            # (H, 4H) — single lane-dense MXU push per step
    whb = whb_ref[...]
    w_out1 = w_out1_ref[...]
    w_out2 = w_out2_ref[...]
    b_out = b_out_ref[...]

    def load_gx(t):
        row = pl.multiple_of(t * Bp, Bp)
        return gx_ref[pl.ds(row, Bp), :]          # (Bp, 8H), depends only on t

    def lstm_step(g4, h, c, whh):
        # One (Bp, H) @ (H, 4H) matmul on the serial chain; the four gate slices
        # are static 32-lane selects of the (Bp, 128) result (VPU/XLU, off the
        # MXU/EUP critical path).
        pre = g4 + jnp.dot(h.astype(jnp.bfloat16), whh,
                           preferred_element_type=jnp.float32)
        i = jax.nn.sigmoid(pre[:, 0 * H:1 * H])
        f = jax.nn.sigmoid(pre[:, 1 * H:2 * H])
        g = jnp.tanh(pre[:, 2 * H:3 * H])
        o = jax.nn.sigmoid(pre[:, 3 * H:4 * H])
        c_new = f * c + i * g
        h_new = o * jnp.tanh(c_new)
        return h_new, c_new

    zeros = jnp.zeros((Bp, H), jnp.float32)

    # ---- interleaved forward/backward recurrence: the two chains are
    #      independent, so each step's MXU/EUP latency for one direction hides
    #      under the other's.  fwd partial (+bias) -> o_ref, bwd partial -> acc.
    def body(k, carry):
        hf, cf, hb, cb = carry
        tf = k
        tb = T - 1 - k
        g_f = load_gx(tf)
        g_b = load_gx(tb)
        hf, cf = lstm_step(g_f[:, :4 * H], hf, cf, whf)
        hb, cb = lstm_step(g_b[:, 4 * H:], hb, cb, whb)
        o_ref[tf] = (jnp.dot(hf.astype(jnp.bfloat16), w_out1,
                             preferred_element_type=jnp.float32) + b_out)
        acc_ref[tb] = jnp.dot(hb.astype(jnp.bfloat16), w_out2,
                              preferred_element_type=jnp.float32)
        return (hf, cf, hb, cb)

    lax.fori_loop(0, T, body, (zeros, zeros, zeros, zeros), unroll=True)

    # ---- single vectorized combine of the two direction halves (lane-dense).
    o_ref[...] = o_ref[...] + acc_ref[...]


# ---------------------------- host / XLA glue -------------------------------------
@functools.lru_cache(maxsize=128)
def _interp_matrix(L, T):
    """(T, L) numpy bilinear (align_corners=True) length-resize matrix (bounded cache)."""
    if T == 1:
        src = np.zeros((1,), np.float32)
    else:
        src = np.arange(T, dtype=np.float32) * (L - 1) / (T - 1)
    i0 = np.floor(src).astype(np.int32)
    i1 = np.minimum(i0 + 1, L - 1)
    w1 = (src - i0).astype(np.float32)
    A = np.zeros((T, L), np.float32)
    A[np.arange(T), i0] += 1.0 - w1
    A[np.arange(T), i1] += w1
    return A


def _build_idx_and_interp(words, max_length):
    """Pad variable-length char sequences to a common Lmax and stack the per-word
    interp matrices -> ONE batched gather + ONE einsum replace the per-word loop."""
    B = len(words)
    T = int(max_length)
    lengths = [int(w.shape[0]) for w in words]
    Lmax = max(lengths)
    A = np.zeros((B, T, Lmax), np.float32)
    idx = np.zeros((B, Lmax), np.int32)
    for b, (w, L) in enumerate(zip(words, lengths)):
        A[b, :, :L] = _interp_matrix(L, T)
        idx[b, :L] = np.asarray(w)
    return jnp.asarray(idx), jnp.asarray(A)


@jax.jit
def _forward_core(idx, A, params):
    """idx: (B, Lmax) i32 padded char indices, A: (B, T, Lmax) f32 interp -> (B, T, O)."""
    B, T, _ = A.shape
    D = params["char_emb"].shape[1]
    H = params["whf"].shape[0]
    O = params["w_out1"].shape[1]
    Bp = max(8, -(-B // 8) * 8)           # pad batch to fill >= 8 sublanes
    bf = jnp.bfloat16

    # batched embedding gather + bilinear length interpolation (f32)
    emb = jnp.take(params["char_emb"], idx, axis=0)           # (B, Lmax, D)
    x_emb = jnp.einsum("btl,bld->btd", A, emb)                # (B, T, D)

    # time-major + batch pad + bf16 MXU operands (interp itself stays f32)
    x = jnp.zeros((T, Bp, D), jnp.float32)
    x = x.at[:, :B, :].set(jnp.transpose(x_emb, (1, 0, 2)))
    x = x.reshape(T * Bp, D).astype(bf)

    # Whole-array VMEM specs are fine at these sizes (<200 KiB total).
    # TODO(synk): before scaling batch/max_length/out_channels, add a grid over
    # the padded-batch axis with BlockSpec tiling + dimension_semantics=("parallel",)
    # (shards across v7x's 2 TensorCores) and set vmem_limit_bytes; size the batch
    # tile for v7x's 64 MiB VMEM / v5e's 16 MiB scoped default.
    out = pl.pallas_call(
        word_embedding_kernel,
        out_shape=jax.ShapeDtypeStruct((T, Bp, O), jnp.float32),
        in_specs=[VMEM_SPEC] * 10,
        out_specs=VMEM_SPEC,
        scratch_shapes=[
            pltpu.VMEM((T * Bp, 8 * H), jnp.float32),   # hoisted gate pre-activations
            pltpu.VMEM((T, Bp, O), jnp.float32),        # bwd-direction output partials
        ],
    )(x,
      params["w_enc"].astype(bf), params["b_enc"],
      params["w_ih"].astype(bf), params["b_ih"],
      params["whf"].astype(bf), params["whb"].astype(bf),
      params["w_out1"].astype(bf), params["w_out2"].astype(bf),
      params["b_out"])

    # (T, Bp, O) -> drop batch padding -> (B, T, O), matching forward's final permute.
    return out[:, :B, :].transpose(1, 0, 2)


def word_embedding_forward(words, params, max_length):
    """words: list of 1-D int32 arrays of char indices (variable lengths)."""
    idx, A = _build_idx_and_interp(words, max_length)
    return _forward_core(idx, A, params)


def init_params(key, vocab, emb_dim, char_dim, hidden, out_channels):
    """f32 master weights; bf16 casts happen only at MXU-operand use."""
    ks = jax.random.split(key, 10)
    f32 = jnp.float32

    def u(k, shape, scale):
        return jax.random.uniform(k, shape, f32, -scale, scale)

    s_enc = 1.0 / math.sqrt(emb_dim)
    s_lstm = 1.0 / math.sqrt(hidden)
    s_out = 1.0 / math.sqrt(2.0 * hidden)
    return {
        # nn.Embedding(len(lexicon), embedding_dim)
        "char_emb": jax.random.normal(ks[0], (vocab, emb_dim), f32),
        # char_encoder: Linear(embedding_dim, char_vector_dim) + ReLU
        "w_enc": u(ks[1], (emb_dim, char_dim), s_enc),
        "b_enc": u(ks[2], (1, char_dim), s_enc),
        # LSTM input->hidden, both directions fused: [fwd i,f,g,o | bwd i,f,g,o]
        # NOTE: b_ih represents PyTorch's (b_ih + b_hh); single sample here, so the
        # init distribution differs slightly from PyTorch's two-bias init (forward
        # math is identical).
        "w_ih": u(ks[3], (char_dim, 8 * hidden), s_lstm),
        "b_ih": u(ks[4], (1, 8 * hidden), s_lstm),
        # LSTM hidden->hidden, fused per-direction (H, 4H) with columns [i|f|g|o]
        "whf": u(ks[5], (hidden, 4 * hidden), s_lstm),
        "whb": u(ks[6], (hidden, 4 * hidden), s_lstm),
        # BidirectionalLSTM.embedding Linear(2*hidden, out_channels), split yf/yb halves
        "w_out1": u(ks[7], (hidden, out_channels), s_out),
        "w_out2": u(ks[8], (hidden, out_channels), s_out),
        "b_out": u(ks[9], (1, out_channels), s_out),
    }


# ---------------------------- pure-JAX reference ----------------------------------
def reference_forward(words, params, max_length):
    """Matches the kernel's numerics (f32 masters, bf16 MXU operands, f32 accum)."""
    idx, A = _build_idx_and_interp(words, max_length)
    emb = jnp.take(params["char_emb"], idx, axis=0)
    x_emb = jnp.einsum("btl,bld->btd", A, emb)                # (B, T, D) f32
    B, T, D = x_emb.shape
    H = params["whf"].shape[0]
    bf = jnp.bfloat16

    xb = jnp.transpose(x_emb, (1, 0, 2)).reshape(T * B, D).astype(bf)
    cv = jnp.maximum(
        jnp.dot(xb, params["w_enc"].astype(bf), preferred_element_type=jnp.float32)
        + params["b_enc"], 0.0)
    gx = (jnp.dot(cv.astype(bf), params["w_ih"].astype(bf),
                  preferred_element_type=jnp.float32)
          + params["b_ih"]).reshape(T, B, 8 * H)

    def cell(g4, h, c, whh):
        pre = g4 + jnp.dot(h.astype(bf), whh.astype(bf),
                           preferred_element_type=jnp.float32)
        i = jax.nn.sigmoid(pre[:, 0 * H:1 * H])
        f = jax.nn.sigmoid(pre[:, 1 * H:2 * H])
        g = jnp.tanh(pre[:, 2 * H:3 * H])
        o = jax.nn.sigmoid(pre[:, 3 * H:4 * H])
        c = f * c + i * g
        return o * jnp.tanh(c), c

    h = c = jnp.zeros((B, H), jnp.float32)
    yf = []
    for t in range(T):
        h, c = cell(gx[t, :, :4 * H], h, c, params["whf"])
        yf.append(h)
    h = c = jnp.zeros((B, H), jnp.float32)
    yb = [None] * T
    for t in range(T - 1, -1, -1):
        h, c = cell(gx[t, :, 4 * H:], h, c, params["whb"])
        yb[t] = h

    yf = jnp.stack(yf).reshape(T * B, H).astype(bf)
    yb = jnp.stack(yb).reshape(T * B, H).astype(bf)
    out = (jnp.dot(yf, params["w_out1"].astype(bf), preferred_element_type=jnp.float32)
           + jnp.dot(yb, params["w_out2"].astype(bf), preferred_element_type=jnp.float32)
           + params["b_out"])
    return out.reshape(T, B, -1).transpose(1, 0, 2)


if __name__ == "__main__":
    # Small, module-consistent sizes (lane-dense gate width 4H=128 and output O=128).
    lexicon = string.ascii_lowercase + string.digits     # 36 chars
    V = len(lexicon)
    embedding_dim = 32
    char_vector_dim = 32
    hidden = 32
    out_channels = 128
    max_length = 8
    batch = 2

    key = jax.random.PRNGKey(0)
    kp, kw1, kw2 = jax.random.split(key, 3)
    params = init_params(kp, V, embedding_dim, char_vector_dim, hidden, out_channels)

    # Two words of different lengths (like the PyTorch list-of-tensors input).
    words = [
        jax.random.randint(kw1, (12,), 0, V, dtype=jnp.int32),
        jax.random.randint(kw2, (5,), 0, V, dtype=jnp.int32),
    ]

    out = word_embedding_forward(words, params, max_length)
    out = jax.block_until_ready(out)
    assert out.shape == (batch, max_length, out_channels), out.shape
    assert bool(jnp.all(jnp.isfinite(out)))

    ref = reference_forward(words, params, max_length)
    err = float(jnp.max(jnp.abs(out - ref)))
    assert err < 2e-2, f"max |pallas - reference| = {err}"

    print("KERNEL_OK")
</pallas_src>

<mosaic_0001>
module attributes {stable_mosaic.version = 11 : i64} {
  func.func @word_embedding_kernel(%arg0: memref<64x32xbf16, #tpu.memory_space<vmem>>, %arg1: memref<32x32xbf16, #tpu.memory_space<vmem>>, %arg2: memref<1x32xf32, #tpu.memory_space<vmem>>, %arg3: memref<32x256xbf16, #tpu.memory_space<vmem>>, %arg4: memref<1x256xf32, #tpu.memory_space<vmem>>, %arg5: memref<32x128xbf16, #tpu.memory_space<vmem>>, %arg6: memref<32x128xbf16, #tpu.memory_space<vmem>>, %arg7: memref<32x128xbf16, #tpu.memory_space<vmem>>, %arg8: memref<32x128xbf16, #tpu.memory_space<vmem>>, %arg9: memref<1x128xf32, #tpu.memory_space<vmem>>, %arg10: memref<8x8x128xf32, #tpu.memory_space<vmem>>, %arg11: memref<64x256xf32, #tpu.memory_space<vmem>>, %arg12: memref<8x8x128xf32, #tpu.memory_space<vmem>>) attributes {dimension_semantics = [], scalar_prefetch = 0 : i64, scratch_operands = 2 : i64, tpu.core_type = #tpu.core_type<tc>} {
    %c0 = arith.constant 0 : index
    %c0_0 = arith.constant 0 : index
    %0 = vector.load %arg0[%c0, %c0_0] : memref<64x32xbf16, #tpu.memory_space<vmem>>, vector<64x32xbf16>
    %c0_1 = arith.constant 0 : index
    %c0_2 = arith.constant 0 : index
    %1 = vector.load %arg1[%c0_1, %c0_2] : memref<32x32xbf16, #tpu.memory_space<vmem>>, vector<32x32xbf16>
    %cst = arith.constant dense<0.000000e+00> : vector<64x32xf32>
    %2 = tpu.matmul %0, %1, %cst {dimension_numbers = #tpu.dot_dimension_numbers<[1], [0], [0], [1], [0, 0, 1, 1], [], []>} : vector<64x32xbf16>, vector<32x32xbf16>, vector<64x32xf32> -> vector<64x32xf32>
    %c0_3 = arith.constant 0 : index
    %c0_4 = arith.constant 0 : index
    %3 = vector.load %arg2[%c0_3, %c0_4] : memref<1x32xf32, #tpu.memory_space<vmem>>, vector<1x32xf32>
    %4 = vector.broadcast %3 : vector<1x32xf32> to vector<64x32xf32>
    %5 = arith.addf %2, %4 : vector<64x32xf32>
    %cst_5 = arith.constant 0.000000e+00 : f32
    %6 = vector.broadcast %cst_5 : f32 to vector<64x32xf32>
    %7 = arith.maximumf %5, %6 : vector<64x32xf32>
    %8 = arith.truncf %7 : vector<64x32xf32> to vector<64x32xbf16>
    %c0_6 = arith.constant 0 : index
    %c0_7 = arith.constant 0 : index
    %9 = vector.load %arg3[%c0_6, %c0_7] : memref<32x256xbf16, #tpu.memory_space<vmem>>, vector<32x256xbf16>
    %cst_8 = arith.constant dense<0.000000e+00> : vector<64x256xf32>
    %10 = tpu.matmul %8, %9, %cst_8 {dimension_numbers = #tpu.dot_dimension_numbers<[1], [0], [0], [1], [0, 0, 1, 1], [], []>} : vector<64x32xbf16>, vector<32x256xbf16>, vector<64x256xf32> -> vector<64x256xf32>
    %c0_9 = arith.constant 0 : index
    %c0_10 = arith.constant 0 : index
    %11 = vector.load %arg4[%c0_9, %c0_10] : memref<1x256xf32, #tpu.memory_space<vmem>>, vector<1x256xf32>
    %12 = vector.broadcast %11 : vector<1x256xf32> to vector<64x256xf32>
    %13 = arith.addf %10, %12 : vector<64x256xf32>
    %c0_11 = arith.constant 0 : index
    %c0_12 = arith.constant 0 : index
    %14 = vector.load %arg11[%c0_11, %c0_12] : memref<64x256xf32, #tpu.memory_space<vmem>>, vector<64x256xf32>
    tpu.vector_store %arg11[%c0_11, %c0_12], %13 {strides = array<i32>} : memref<64x256xf32, #tpu.memory_space<vmem>>, vector<64x256xf32>,
    %c0_13 = arith.constant 0 : index
    %c0_14 = arith.constant 0 : index
    %15 = vector.load %arg5[%c0_13, %c0_14] : memref<32x128xbf16, #tpu.memory_space<vmem>>, vector<32x128xbf16>
    %c0_15 = arith.constant 0 : index
    %c0_16 = arith.constant 0 : index
    %16 = vector.load %arg6[%c0_15, %c0_16] : memref<32x128xbf16, #tpu.memory_space<vmem>>, vector<32x128xbf16>
    %c0_17 = arith.constant 0 : index
    %c0_18 = arith.constant 0 : index
    %17 = vector.load %arg7[%c0_17, %c0_18] : memref<32x128xbf16, #tpu.memory_space<vmem>>, vector<32x128xbf16>
    %c0_19 = arith.constant 0 : index
    %c0_20 = arith.constant 0 : index
    %18 = vector.load %arg8[%c0_19, %c0_20] : memref<32x128xbf16, #tpu.memory_space<vmem>>, vector<32x128xbf16>
    %c0_21 = arith.constant 0 : index
    %c0_22 = arith.constant 0 : index
    %19 = vector.load %arg9[%c0_21, %c0_22] : memref<1x128xf32, #tpu.memory_space<vmem>>, vector<1x128xf32>
    %cst_23 = arith.constant 0.000000e+00 : f32
    %20 = vector.broadcast %cst_23 : f32 to vector<8x32xf32>
    %c0_i32 = arith.constant 0 : i32
    %c7_i32 = arith.constant 7 : i32
    %21 = arith.subi %c7_i32, %c0_i32 : i32
    %c8_i32 = arith.constant 8 : i32
    %22 = arith.muli %c0_i32, %c8_i32 : i32
    %23 = tpu.assume_multiple %22, 8 : i32
    %24 = arith.index_cast %23 : i32 to index
    %c0_24 = arith.constant 0 : index
    %25 = vector.load %arg11[%24, %c0_24] : memref<64x256xf32, #tpu.memory_space<vmem>>, vector<8x256xf32>
    %c8_i32_25 = arith.constant 8 : i32
    %26 = arith.muli %21, %c8_i32_25 : i32
    %27 = tpu.assume_multiple %26, 8 : i32
    %28 = arith.index_cast %27 : i32 to index
    %c0_26 = arith.constant 0 : index
    %29 = vector.load %arg11[%28, %c0_26] : memref<64x256xf32, #tpu.memory_space<vmem>>, vector<8x256xf32>
    %30 = vector.extract_strided_slice %25 {offsets = [0, 0], sizes = [8, 128], strides = [1, 1]} : vector<8x256xf32> to vector<8x128xf32>
    %31 = arith.truncf %20 : vector<8x32xf32> to vector<8x32xbf16>
    %cst_27 = arith.constant dense<0.000000e+00> : vector<8x128xf32>
    %32 = tpu.matmul %31, %15, %cst_27 {dimension_numbers = #tpu.dot_dimension_numbers<[1], [0], [0], [1], [0, 0, 1, 1], [], []>} : vector<8x32xbf16>, vector<32x128xbf16>, vector<8x128xf32> -> vector<8x128xf32>
    %33 = arith.addf %30, %32 : vector<8x128xf32>
    %34 = vector.extract_strided_slice %33 {offsets = [0, 0], sizes = [8, 32], strides = [1, 1]} : vector<8x128xf32> to vector<8x32xf32>
    %35 = arith.negf %34 : vector<8x32xf32>
    %36 = math.exp %35 : vector<8x32xf32>
    %cst_28 = arith.constant 1.000000e+00 : f32
    %37 = vector.broadcast %cst_28 : f32 to vector<8x32xf32>
    %38 = arith.addf %37, %36 : vector<8x32xf32>
    %39 = arith.divf %37, %38 : vector<8x32xf32>
    %40 = vector.extract_strided_slice %33 {offsets = [0, 32], sizes = [8, 32], strides = [1, 1]} : vector<8x128xf32> to vector<8x32xf32>
    %41 = arith.negf %40 : vector<8x32xf32>
    %42 = math.exp %41 : vector<8x32xf32>
    %cst_29 = arith.constant 1.000000e+00 : f32
    %43 = vector.broadcast %cst_29 : f32 to vector<8x32xf32>
    %44 = arith.addf %43, %42 : vector<8x32xf32>
    %45 = arith.divf %43, %44 : vector<8x32xf32>
    %46 = vector.extract_strided_slice %33 {offsets = [0, 64], sizes = [8, 32], strides = [1, 1]} : vector<8x128xf32> to vector<8x32xf32>
    %47 = math.tanh %46 : vector<8x32xf32>
    %48 = vector.extract_strided_slice %33 {offsets = [0, 96], sizes = [8, 32], strides = [1, 1]} : vector<8x128xf32> to vector<8x32xf32>
    %49 = arith.negf %48 : vector<8x32xf32>
    %50 = math.exp %49 : vector<8x32xf32>
    %cst_30 = arith.constant 1.000000e+00 : f32
    %51 = vector.broadcast %cst_30 : f32 to vector<8x32xf32>
    %52 = arith.addf %51, %50 : vector<8x32xf32>
    %53 = arith.divf %51, %52 : vector<8x32xf32>
    %54 = arith.mulf %45, %20 : vector<8x32xf32>
    %55 = arith.mulf %39, %47 : vector<8x32xf32>
    %56 = arith.addf %54, %55 : vector<8x32xf32>
    %57 = math.tanh %56 : vector<8x32xf32>
    %58 = arith.mulf %53, %57 : vector<8x32xf32>
    %59 = vector.extract_strided_slice %29 {offsets = [0, 128], sizes = [8, 128], strides = [1, 1]} : vector<8x256xf32> to vector<8x128xf32>
    %60 = arith.truncf %20 : vector<8x32xf32> to vector<8x32xbf16>
    %cst_31 = arith.constant dense<0.000000e+00> : vector<8x128xf32>
    %61 = tpu.matmul %60, %16, %cst_31 {dimension_numbers = #tpu.dot_dimension_numbers<[1], [0], [0], [1], [0, 0, 1, 1], [], []>} : vector<8x32xbf16>, vector<32x128xbf16>, vector<8x128xf32> -> vector<8x128xf32>
    %62 = arith.addf %59, %61 : vector<8x128xf32>
    %63 = vector.extract_strided_slice %62 {offsets = [0, 0], sizes = [8, 32], strides = [1, 1]} : vector<8x128xf32> to vector<8x32xf32>
    %64 = arith.negf %63 : vector<8x32xf32>
    %65 = math.exp %64 : vector<8x32xf32>
    %cst_32 = arith.constant 1.000000e+00 : f32
    %66 = vector.broadcast %cst_32 : f32 to vector<8x32xf32>
    %67 = arith.addf %66, %65 : vector<8x32xf32>
    %68 = arith.divf %66, %67 : vector<8x32xf32>
    %69 = vector.extract_strided_slice %62 {offsets = [0, 32], sizes = [8, 32], strides = [1, 1]} : vector<8x128xf32> to vector<8x32xf32>
    %70 = arith.negf %69 : vector<8x32xf32>
    %71 = math.exp %70 : vector<8x32xf32>
    %cst_33 = arith.constant 1.000000e+00 : f32
    %72 = vector.broadcast %cst_33 : f32 to vector<8x32xf32>
    %73 = arith.addf %72, %71 : vector<8x32xf32>
    %74 = arith.divf %72, %73 : vector<8x32xf32>
    %75 = vector.extract_strided_slice %62 {offsets = [0, 64], sizes = [8, 32], strides = [1, 1]} : vector<8x128xf32> to vector<8x32xf32>
    %76 = math.tanh %75 : vector<8x32xf32>
    %77 = vector.extract_strided_slice %62 {offsets = [0, 96], sizes = [8, 32], strides = [1, 1]} : vector<8x128xf32> to vector<8x32xf32>
    %78 = arith.negf %77 : vector<8x32xf32>
    %79 = math.exp %78 : vector<8x32xf32>
    %cst_34 = arith.constant 1.000000e+00 : f32
    %80 = vector.broadcast %cst_34 : f32 to vector<8x32xf32>
    %81 = arith.addf %80, %79 : vector<8x32xf32>
    %82 = arith.divf %80, %81 : vector<8x32xf32>
    %83 = arith.mulf %74, %20 : vector<8x32xf32>
    %84 = arith.mulf %68, %76 : vector<8x32xf32>
    %85 = arith.addf %83, %84 : vector<8x32xf32>
    %86 = math.tanh %85 : vector<8x32xf32>
    %87 = arith.mulf %82, %86 : vector<8x32xf32>
    %88 = arith.truncf %58 : vector<8x32xf32> to vector<8x32xbf16>
    %cst_35 = arith.constant dense<0.000000e+00> : vector<8x128xf32>
    %89 = tpu.matmul %88, %17, %cst_35 {dimension_numbers = #tpu.dot_dimension_numbers<[1], [0], [0], [1], [0, 0, 1, 1], [], []>} : vector<8x32xbf16>, vector<32x128xbf16>, vector<8x128xf32> -> vector<8x128xf32>
    %90 = vector.broadcast %19 : vector<1x128xf32> to vector<8x128xf32>
    %91 = arith.addf %89, %90 : vector<8x128xf32>
    %92 = arith.index_cast %c0_i32 : i32 to index
    %c0_36 = arith.constant 0 : index
    %c0_37 = arith.constant 0 : index
    %93 = vector.load %arg10[%92, %c0_36, %c0_37] : memref<8x8x128xf32, #tpu.memory_space<vmem>>, vector<1x8x128xf32>
    %94 = vector.shape_cast %93 : vector<1x8x128xf32> to vector<8x128xf32>
    %95 = vector.shape_cast %91 : vector<8x128xf32> to vector<1x8x128xf32>
    tpu.vector_store %arg10[%92, %c0_36, %c0_37], %95 {strides = array<i32>} : memref<8x8x128xf32, #tpu.memory_space<vmem>>, vector<1x8x128xf32>,
    %96 = arith.truncf %87 : vector<8x32xf32> to vector<8x32xbf16>
    %cst_38 = arith.constant dense<0.000000e+00> : vector<8x128xf32>
    %97 = tpu.matmul %96, %18, %cst_38 {dimension_numbers = #tpu.dot_dimension_numbers<[1], [0], [0], [1], [0, 0, 1, 1], [], []>} : vector<8x32xbf16>, vector<32x128xbf16>, vector<8x128xf32> -> vector<8x128xf32>
    %98 = arith.index_cast %21 : i32 to index
    %c0_39 = arith.constant 0 : index
    %c0_40 = arith.constant 0 : index
    %99 = vector.load %arg12[%98, %c0_39, %c0_40] : memref<8x8x128xf32, #tpu.memory_space<vmem>>, vector<1x8x128xf32>
    %100 = vector.shape_cast %99 : vector<1x8x128xf32> to vector<8x128xf32>
    %101 = vector.shape_cast %97 : vector<8x128xf32> to vector<1x8x128xf32>
    tpu.vector_store %arg12[%98, %c0_39, %c0_40], %101 {strides = array<i32>} : memref<8x8x128xf32, #tpu.memory_space<vmem>>, vector<1x8x128xf32>,
    %c1_i32 = arith.constant 1 : i32
    %c7_i32_41 = arith.constant 7 : i32
    %102 = arith.subi %c7_i32_41, %c1_i32 : i32
    %c8_i32_42 = arith.constant 8 : i32
    %103 = arith.muli %c1_i32, %c8_i32_42 : i32
    %104 = tpu.assume_multiple %103, 8 : i32
    %105 = arith.index_cast %104 : i32 to index
    %c0_43 = arith.constant 0 : index
    %106 = vector.load %arg11[%105, %c0_43] : memref<64x256xf32, #tpu.memory_space<vmem>>, vector<8x256xf32>
    %c8_i32_44 = arith.constant 8 : i32
    %107 = arith.muli %102, %c8_i32_44 : i32
    %108 = tpu.assume_multiple %107, 8 : i32
    %109 = arith.index_cast %108 : i32 to index
    %c0_45 = arith.constant 0 : index
    %110 = vector.load %arg11[%109, %c0_45] : memref<64x256xf32, #tpu.memory_space<vmem>>, vector<8x256xf32>
    %111 = vector.extract_strided_slice %106 {offsets = [0, 0], sizes = [8, 128], strides = [1, 1]} : vector<8x256xf32> to vector<8x128xf32>
    %112 = arith.truncf %58 : vector<8x32xf32> to vector<8x32xbf16>
    %cst_46 = arith.constant dense<0.000000e+00> : vector<8x128xf32>
    %113 = tpu.matmul %112, %15, %cst_46 {dimension_numbers = #tpu.dot_dimension_numbers<[1], [0], [0], [1], [0, 0, 1, 1], [], []>} : vector<8x32xbf16>, vector<32x128xbf16>, vector<8x128xf32> -> vector<8x128xf32>
    %114 = arith.addf %111, %113 : vector<8x128xf32>
    %115 = vector.extract_strided_slice %114 {offsets = [0, 0], sizes = [8, 32], strides = [1, 1]} : vector<8x128xf32> to vector<8x32xf32>
    %116 = arith.negf %115 : vector<8x32xf32>
    %117 = math.exp %116 : vector<8x32xf32>
    %cst_47 = arith.constant 1.000000e+00 : f32
    %118 = vector.broadcast %cst_47 : f32 to vector<8x32xf32>
    %119 = arith.addf %118, %117 : vector<8x32xf32>
    %120 = arith.divf %118, %119 : vector<8x32xf32>
    %121 = vector.extract_strided_slice %114 {offsets = [0, 32], sizes = [8, 32], strides = [1, 1]} : vector<8x128xf32> to vector<8x32xf32>
    %122 = arith.negf %121 : vector<8x32xf32>
    %123 = math.exp %122 : vector<8x32xf32>
    %cst_48 = arith.constant 1.000000e+00 : f32
    %124 = vector.broadcast %cst_48 : f32 to vector<8x32xf32>
    %125 = arith.addf %124, %123 : vector<8x32xf32>
    %126 = arith.divf %124, %125 : vector<8x32xf32>
    %127 = vector.extract_strided_slice %114 {offsets = [0, 64], sizes = [8, 32], strides = [1, 1]} : vector<8x128xf32> to vector<8x32xf32>
    %128 = math.tanh %127 : vector<8x32xf32>
    %129 = vector.extract_strided_slice %114 {offsets = [0, 96], sizes = [8, 32], strides = [1, 1]} : vector<8x128xf32> to vector<8x32xf32>
    %130 = arith.negf %129 : vector<8x32xf32>
    %131 = math.exp %130 : vector<8x32xf32>
    %cst_49 = arith.constant 1.000000e+00 : f32
    %132 = vector.broadcast %cst_49 : f32 to vector<8x32xf32>
    %133 = arith.addf %132, %131 : vector<8x32xf32>
    %134 = arith.divf %132, %133 : vector<8x32xf32>
    %135 = arith.mulf %126, %56 : vector<8x32xf32>
    %136 = arith.mulf %120, %128 : vector<8x32xf32>
    %137 = arith.addf %135, %136 : vector<8x32xf32>
    %138 = math.tanh %137 : vector<8x32xf32>
    %139 = arith.mulf %134, %138 : vector<8x32xf32>
    %140 = vector.extract_strided_slice %110 {offsets = [0, 128], sizes = [8, 128], strides = [1, 1]} : vector<8x256xf32> to vector<8x128xf32>
    %141 = arith.truncf %87 : vector<8x32xf32> to vector<8x32xbf16>
    %cst_50 = arith.constant dense<0.000000e+00> : vector<8x128xf32>
    %142 = tpu.matmul %141, %16, %cst_50 {dimension_numbers = #tpu.dot_dimension_numbers<[1], [0], [0], [1], [0, 0, 1, 1], [], []>} : vector<8x32xbf16>, vector<32x128xbf16>, vector<8x128xf32> -> vector<8x128xf32>
    %143 = arith.addf %140, %142 : vector<8x128xf32>
    %144 = vector.extract_strided_slice %143 {offsets = [0, 0], sizes = [8, 32], strides = [1, 1]} : vector<8x128xf32> to vector<8x32xf32>
    %145 = arith.negf %144 : vector<8x32xf32>
    %146 = math.exp %145 : vector<8x32xf32>
    %cst_51 = arith.constant 1.000000e+00 : f32
    %147 = vector.broadcast %cst_51 : f32 to vector<8x32xf32>
    %148 = arith.addf %147, %146 : vector<8x32xf32>
    %149 = arith.divf %147, %148 : vector<8x32xf32>
    %150 = vector.extract_strided_slice %143 {offsets = [0, 32], sizes = [8, 32], strides = [1, 1]} : vector<8x128xf32> to vector<8x32xf32>
    %151 = arith.negf %150 : vector<8x32xf32>
    %152 = math.exp %151 : vector<8x32xf32>
    %cst_52 = arith.constant 1.000000e+00 : f32
    %153 = vector.broadcast %cst_52 : f32 to vector<8x32xf32>
    %154 = arith.addf %153, %152 : vector<8x32xf32>
    %155 = arith.divf %153, %154 : vector<8x32xf32>
    %156 = vector.extract_strided_slice %143 {offsets = [0, 64], sizes = [8, 32], strides = [1, 1]} : vector<8x128xf32> to vector<8x32xf32>
    %157 = math.tanh %156 : vector<8x32xf32>
    %158 = vector.extract_strided_slice %143 {offsets = [0, 96], sizes = [8, 32], strides = [1, 1]} : vector<8x128xf32> to vector<8x32xf32>
    %159 = arith.negf %158 : vector<8x32xf32>
    %160 = math.exp %159 : vector<8x32xf32>
    %cst_53 = arith.constant 1.000000e+00 : f32
    %161 = vector.broadcast %cst_53 : f32 to vector<8x32xf32>
    %162 = arith.addf %161, %160 : vector<8x32xf32>
    %163 = arith.divf %161, %162 : vector<8x32xf32>
    %164 = arith.mulf %155, %85 : vector<8x32xf32>
    %165 = arith.mulf %149, %157 : vector<8x32xf32>
    %166 = arith.addf %164, %165 : vector<8x32xf32>
    %167 = math.tanh %166 : vector<8x32xf32>
    %168 = arith.mulf %163, %167 : vector<8x32xf32>
    %169 = arith.truncf %139 : vector<8x32xf32> to vector<8x32xbf16>
    %cst_54 = arith.constant dense<0.000000e+00> : vector<8x128xf32>
    %170 = tpu.matmul %169, %17, %cst_54 {dimension_numbers = #tpu.dot_dimension_numbers<[1], [0], [0], [1], [0, 0, 1, 1], [], []>} : vector<8x32xbf16>, vector<32x128xbf16>, vector<8x128xf32> -> vector<8x128xf32>
    %171 = vector.broadcast %19 : vector<1x128xf32> to vector<8x128xf32>
    %172 = arith.addf %170, %171 : vector<8x128xf32>
    %173 = arith.index_cast %c1_i32 : i32 to index
    %c0_55 = arith.constant 0 : index
    %c0_56 = arith.constant 0 : index
    %174 = vector.load %arg10[%173, %c0_55, %c0_56] : memref<8x8x128xf32, #tpu.memory_space<vmem>>, vector<1x8x128xf32>
    %175 = vector.shape_cast %174 : vector<1x8x128xf32> to vector<8x128xf32>
    %176 = vector.shape_cast %172 : vector<8x128xf32> to vector<1x8x128xf32>
    tpu.vector_store %arg10[%173, %c0_55, %c0_56], %176 {strides = array<i32>} : memref<8x8x128xf32, #tpu.memory_space<vmem>>, vector<1x8x128xf32>,
    %177 = arith.truncf %168 : vector<8x32xf32> to vector<8x32xbf16>
    %cst_57 = arith.constant dense<0.000000e+00> : vector<8x128xf32>
    %178 = tpu.matmul %177, %18, %cst_57 {dimension_numbers = #tpu.dot_dimension_numbers<[1], [0], [0], [1], [0, 0, 1, 1], [], []>} : vector<8x32xbf16>, vector<32x128xbf16>, vector<8x128xf32> -> vector<8x128xf32>
    %179 = arith.index_cast %102 : i32 to index
    %c0_58 = arith.constant 0 : index
    %c0_59 = arith.constant 0 : index
    %180 = vector.load %arg12[%179, %c0_58, %c0_59] : memref<8x8x128xf32, #tpu.memory_space<vmem>>, vector<1x8x128xf32>
    %181 = vector.shape_cast %180 : vector<1x8x128xf32> to vector<8x128xf32>
    %182 = vector.shape_cast %178 : vector<8x128xf32> to vector<1x8x128xf32>
    tpu.vector_store %arg12[%179, %c0_58, %c0_59], %182 {strides = array<i32>} : memref<8x8x128xf32, #tpu.memory_space<vmem>>, vector<1x8x128xf32>,
    %c2_i32 = arith.constant 2 : i32
    %c7_i32_60 = arith.constant 7 : i32
    %183 = arith.subi %c7_i32_60, %c2_i32 : i32
    %c8_i32_61 = arith.constant 8 : i32
    %184 = arith.muli %c2_i32, %c8_i32_61 : i32
    %185 = tpu.assume_multiple %184, 8 : i32
    %186 = arith.index_cast %185 : i32 to index
    %c0_62 = arith.constant 0 : index
    %187 = vector.load %arg11[%186, %c0_62] : memref<64x256xf32, #tpu.memory_space<vmem>>, vector<8x256xf32>
    %c8_i32_63 = arith.constant 8 : i32
    %188 = arith.muli %183, %c8_i32_63 : i32
    %189 = tpu.assume_multiple %188, 8 : i32
    %190 = arith.index_cast %189 : i32 to index
    %c0_64 = arith.constant 0 : index
    %191 = vector.load %arg11[%190, %c0_64] : memref<64x256xf32, #tpu.memory_space<vmem>>, vector<8x256xf32>
    %192 = vector.extract_strided_slice %187 {offsets = [0, 0], sizes = [8, 128], strides = [1, 1]} : vector<8x256xf32> to vector<8x128xf32>
    %193 = arith.truncf %139 : vector<8x32xf32> to vector<8x32xbf16>
    %cst_65 = arith.constant dense<0.000000e+00> : vector<8x128xf32>
    %194 = tpu.matmul %193, %15, %cst_65 {dimension_numbers = #tpu.dot_dimension_numbers<[1], [0], [0], [1], [0, 0, 1, 1], [], []>} : vector<8x32xbf16>, vector<32x128xbf16>, vector<8x128xf32> -> vector<8x128xf32>
    %195 = arith.addf %192, %194 : vector<8x128xf32>
    %196 = vector.extract_strided_slice %195 {offsets = [0, 0], sizes = [8, 32], strides = [1, 1]} : vector<8x128xf32> to vector<8x32xf32>
    %197 = arith.negf %196 : vector<8x32xf32>
    %198 = math.exp %197 : vector<8x32xf32>
    %cst_66 = arith.constant 1.000000e+00 : f32
    %199 = vector.broadcast %cst_66 : f32 to vector<8x32xf32>
    %200 = arith.addf %199, %198 : vector<8x32xf32>
    %201 = arith.divf %199, %200 : vector<8x32xf32>
    %202 = vector.extract_strided_slice %195 {offsets = [0, 32], sizes = [8, 32], strides = [1, 1]} : vector<8x128xf32> to vector<8x32xf32>
    %203 = arith.negf %202 : vector<8x32xf32>
    %204 = math.exp %203 : vector<8x32xf32>
    %cst_67 = arith.constant 1.000000e+00 : f32
    %205 = vector.broadcast %cst_67 : f32 to vector<8x32xf32>
    %206 = arith.addf %205, %204 : vector<8x32xf32>
    %207 = arith.divf %205, %206 : vector<8x32xf32>
    %208 = vector.extract_strided_slice %195 {offsets = [0, 64], sizes = [8, 32], strides = [1, 1]} : vector<8x128xf32> to vector<8x32xf32>
    %209 = math.tanh %208 : vector<8x32xf32>
    %210 = vector.extract_strided_slice %195 {offsets = [0, 96], sizes = [8, 32], strides = [1, 1]} : vector<8x128xf32> to vector<8x32xf32>
    %211 = arith.negf %210 : vector<8x32xf32>
    %212 = math.exp %211 : vector<8x32xf32>
    %cst_68 = arith.constant 1.000000e+00 : f32
    %213 = vector.broadcast %cst_68 : f32 to vector<8x32xf32>
    %214 = arith.addf %213, %212 : vector<8x32xf32>
    %215 = arith.divf %213, %214 : vector<8x32xf32>
    %216 = arith.mulf %207, %137 : vector<8x32xf32>
    %217 = arith.mulf %201, %209 : vector<8x32xf32>
    %218 = arith.addf %216, %217 : vector<8x32xf32>
    %219 = math.tanh %218 : vector<8x32xf32>
    %220 = arith.mulf %215, %219 : vector<8x32xf32>
    %221 = vector.extract_strided_slice %191 {offsets = [0, 128], sizes = [8, 128], strides = [1, 1]} : vector<8x256xf32> to vector<8x128xf32>
    %222 = arith.truncf %168 : vector<8x32xf32> to vector<8x32xbf16>
    %cst_69 = arith.constant dense<0.000000e+00> : vector<8x128xf32>
    %223 = tpu.matmul %222, %16, %cst_69 {dimension_numbers = #tpu.dot_dimension_numbers<[1], [0], [0], [1], [0, 0, 1, 1], [], []>} : vector<8x32xbf16>, vector<32x128xbf16>, vector<8x128xf32> -> vector<8x128xf32>
    %224 = arith.addf %221, %223 : vector<8x128xf32>
    %225 = vector.extract_strided_slice %224 {offsets = [0, 0], sizes = [8, 32], strides = [1, 1]} : vector<8x128xf32> to vector<8x32xf32>
    %226 = arith.negf %225 : vector<8x32xf32>
    %227 = math.exp %226 : vector<8x32xf32>
    %cst_70 = arith.constant 1.000000e+00 : f32
    %228 = vector.broadcast %cst_70 : f32 to vector<8x32xf32>
    %229 = arith.addf %228, %227 : vector<8x32xf32>
    %230 = arith.divf %228, %229 : vector<8x32xf32>
    %231 = vector.extract_strided_slice %224 {offsets = [0, 32], sizes = [8, 32], strides = [1, 1]} : vector<8x128xf32> to vector<8x32xf32>
    %232 = arith.negf %231 : vector<8x32xf32>
    %233 = math.exp %232 : vector<8x32xf32>
    %cst_71 = arith.constant 1.000000e+00 : f32
    %234 = vector.broadcast %cst_71 : f32 to vector<8x32xf32>
    %235 = arith.addf %234, %233 : vector<8x32xf32>
    %236 = arith.divf %234, %235 : vector<8x32xf32>
    %237 = vector.extract_strided_slice %224 {offsets = [0, 64], sizes = [8, 32], strides = [1, 1]} : vector<8x128xf32> to vector<8x32xf32>
    %238 = math.tanh %237 : vector<8x32xf32>
    %239 = vector.extract_strided_slice %224 {offsets = [0, 96], sizes = [8, 32], strides = [1, 1]} : vector<8x128xf32> to vector<8x32xf32>
    %240 = arith.negf %239 : vector<8x32xf32>
    %241 = math.exp %240 : vector<8x32xf32>
    %cst_72 = arith.constant 1.000000e+00 : f32
    %242 = vector.broadcast %cst_72 : f32 to vector<8x32xf32>
    %243 = arith.addf %242, %241 : vector<8x32xf32>
    %244 = arith.divf %242, %243 : vector<8x32xf32>
    %245 = arith.mulf %236, %166 : vector<8x32xf32>
    %246 = arith.mulf %230, %238 : vector<8x32xf32>
    %247 = arith.addf %245, %246 : vector<8x32xf32>
    %248 = math.tanh %247 : vector<8x32xf32>
    %249 = arith.mulf %244, %248 : vector<8x32xf32>
    %250 = arith.truncf %220 : vector<8x32xf32> to vector<8x32xbf16>
    %cst_73 = arith.constant dense<0.000000e+00> : vector<8x128xf32>
    %251 = tpu.matmul %250, %17, %cst_73 {dimension_numbers = #tpu.dot_dimension_numbers<[1], [0], [0], [1], [0, 0, 1, 1], [], []>} : vector<8x32xbf16>, vector<32x128xbf16>, vector<8x128xf32> -> vector<8x128xf32>
    %252 = vector.broadcast %19 : vector<1x128xf32> to vector<8x128xf32>
    %253 = arith.addf %251, %252 : vector<8x128xf32>
    %254 = arith.index_cast %c2_i32 : i32 to index
    %c0_74 = arith.constant 0 : index
    %c0_75 = arith.constant 0 : index
    %255 = vector.load %arg10[%254, %c0_74, %c0_75] : memref<8x8x128xf32, #tpu.memory_space<vmem>>, vector<1x8x128xf32>
    %256 = vector.shape_cast %255 : vector<1x8x128xf32> to vector<8x128xf32>
    %257 = vector.shape_cast %253 : vector<8x128xf32> to vector<1x8x128xf32>
    tpu.vector_store %arg10[%254, %c0_74, %c0_75], %257 {strides = array<i32>} : memref<8x8x128xf32, #tpu.memory_space<vmem>>, vector<1x8x128xf32>,
    %258 = arith.truncf %249 : vector<8x32xf32> to vector<8x32xbf16>
    %cst_76 = arith.constant dense<0.000000e+00> : vector<8x128xf32>
    %259 = tpu.matmul %258, %18, %cst_76 {dimension_numbers = #tpu.dot_dimension_numbers<[1], [0], [0], [1], [0, 0, 1, 1], [], []>} : vector<8x32xbf16>, vector<32x128xbf16>, vector<8x128xf32> -> vector<8x128xf32>
    %260 = arith.index_cast %183 : i32 to index
    %c0_77 = arith.constant 0 : index
    %c0_78 = arith.constant 0 : index
    %261 = vector.load %arg12[%260, %c0_77, %c0_78] : memref<8x8x128xf32, #tpu.memory_space<vmem>>, vector<1x8x128xf32>
    %262 = vector.shape_cast %261 : vector<1x8x128xf32> to vector<8x128xf32>
    %263 = vector.shape_cast %259 : vector<8x128xf32> to vector<1x8x128xf32>
    tpu.vector_store %arg12[%260, %c0_77, %c0_78], %263 {strides = array<i32>} : memref<8x8x128xf32, #tpu.memory_space<vmem>>, vector<1x8x128xf32>,
    %c3_i32 = arith.constant 3 : i32
    %c7_i32_79 = arith.constant 7 : i32
    %264 = arith.subi %c7_i32_79, %c3_i32 : i32
    %c8_i32_80 = arith.constant 8 : i32
    %265 = arith.muli %c3_i32, %c8_i32_80 : i32
    %266 = tpu.assume_multiple %265, 8 : i32
    %267 = arith.index_cast %266 : i32 to index
    %c0_81 = arith.constant 0 : index
    %268 = vector.load %arg11[%267, %c0_81] : memref<64x256xf32, #tpu.memory_space<vmem>>, vector<8x256xf32>
    %c8_i32_82 = arith.constant 8 : i32
    %269 = arith.muli %264, %c8_i32_82 : i32
    %270 = tpu.assume_multiple %269, 8 : i32
    %271 = arith.index_cast %270 : i32 to index
    %c0_83 = arith.constant 0 : index
    %272 = vector.load %arg11[%271, %c0_83] : memref<64x256xf32, #tpu.memory_space<vmem>>, vector<8x256xf32>
    %273 = vector.extract_strided_slice %268 {offsets = [0, 0], sizes = [8, 128], strides = [1, 1]} : vector<8x256xf32> to vector<8x128xf32>
    %274 = arith.truncf %220 : vector<8x32xf32> to vector<8x32xbf16>
    %cst_84 = arith.constant dense<0.000000e+00> : vector<8x128xf32>
    %275 = tpu.matmul %274, %15, %cst_84 {dimension_numbers = #tpu.dot_dimension_numbers<[1], [0], [0], [1], [0, 0, 1, 1], [], []>} : vector<8x32xbf16>, vector<32x128xbf16>, vector<8x128xf32> -> vector<8x128xf32>
    %276 = arith.addf %273, %275 : vector<8x128xf32>
    %277 = vector.extract_strided_slice %276 {offsets = [0, 0], sizes = [8, 32], strides = [1, 1]} : vector<8x128xf32> to vector<8x32xf32>
    %278 = arith.negf %277 : vector<8x32xf32>
    %279 = math.exp %278 : vector<8x32xf32>
    %cst_85 = arith.constant 1.000000e+00 : f32
    %280 = vector.broadcast %cst_85 : f32 to vector<8x32xf32>
    %281 = arith.addf %280, %279 : vector<8x32xf32>
    %282 = arith.divf %280, %281 : vector<8x32xf32>
    %283 = vector.extract_strided_slice %276 {offsets = [0, 32], sizes = [8, 32], strides = [1, 1]} : vector<8x128xf32> to vector<8x32xf32>
    %284 = arith.negf %283 : vector<8x32xf32>
    %285 = math.exp %284 : vector<8x32xf32>
    %cst_86 = arith.constant 1.000000e+00 : f32
    %286 = vector.broadcast %cst_86 : f32 to vector<8x32xf32>
    %287 = arith.addf %286, %285 : vector<8x32xf32>
    %288 = arith.divf %286, %287 : vector<8x32xf32>
    %289 = vector.extract_strided_slice %276 {offsets = [0, 64], sizes = [8, 32], strides = [1, 1]} : vector<8x128xf32> to vector<8x32xf32>
    %290 = math.tanh %289 : vector<8x32xf32>
    %291 = vector.extract_strided_slice %276 {offsets = [0, 96], sizes = [8, 32], strides = [1, 1]} : vector<8x128xf32> to vector<8x32xf32>
    %292 = arith.negf %291 : vector<8x32xf32>
    %293 = math.exp %292 : vector<8x32xf32>
    %cst_87 = arith.constant 1.000000e+00 : f32
    %294 = vector.broadcast %cst_87 : f32 to vector<8x32xf32>
    %295 = arith.addf %294, %293 : vector<8x32xf32>
    %296 = arith.divf %294, %295 : vector<8x32xf32>
    %297 = arith.mulf %288, %218 : vector<8x32xf32>
    %298 = arith.mulf %282, %290 : vector<8x32xf32>
    %299 = arith.addf %297, %298 : vector<8x32xf32>
    %300 = math.tanh %299 : vector<8x32xf32>
    %301 = arith.mulf %296, %300 : vector<8x32xf32>
    %302 = vector.extract_strided_slice %272 {offsets = [0, 128], sizes = [8, 128], strides = [1, 1]} : vector<8x256xf32> to vector<8x128xf32>
    %303 = arith.truncf %249 : vector<8x32xf32> to vector<8x32xbf16>
    %cst_88 = arith.constant dense<0.000000e+00> : vector<8x128xf32>
    %304 = tpu.matmul %303, %16, %cst_88 {dimension_numbers = #tpu.dot_dimension_numbers<[1], [0], [0], [1], [0, 0, 1, 1], [], []>} : vector<8x32xbf16>, vector<32x128xbf16>, vector<8x128xf32> -> vector<8x128xf32>
    %305 = arith.addf %302, %304 : vector<8x128xf32>
    %306 = vector.extract_strided_slice %305 {offsets = [0, 0], sizes = [8, 32], strides = [1, 1]} : vector<8x128xf32> to vector<8x32xf32>
    %307 = arith.negf %306 : vector<8x32xf32>
    %308 = math.exp %307 : vector<8x32xf32>
    %cst_89 = arith.constant 1.000000e+00 : f32
    %309 = vector.broadcast %cst_89 : f32 to vector<8x32xf32>
    %310 = arith.addf %309, %308 : vector<8x32xf32>
    %311 = arith.divf %309, %310 : vector<8x32xf32>
    %312 = vector.extract_strided_slice %305 {offsets = [0, 32], sizes = [8, 32], strides = [1, 1]} : vector<8x128xf32> to vector<8x32xf32>
    %313 = arith.negf %312 : vector<8x32xf32>
    %314 = math.exp %313 : vector<8x32xf32>
    %cst_90 = arith.constant 1.000000e+00 : f32
    %315 = vector.broadcast %cst_90 : f32 to vector<8x32xf32>
    %316 = arith.addf %315, %314 : vector<8x32xf32>
    %317 = arith.divf %315, %316 : vector<8x32xf32>
    %318 = vector.extract_strided_slice %305 {offsets = [0, 64], sizes = [8, 32], strides = [1, 1]} : vector<8x128xf32> to vector<8x32xf32>
    %319 = math.tanh %318 : vector<8x32xf32>
    %320 = vector.extract_strided_slice %305 {offsets = [0, 96], sizes = [8, 32], strides = [1, 1]} : vector<8x128xf32> to vector<8x32xf32>
    %321 = arith.negf %320 : vector<8x32xf32>
    %322 = math.exp %321 : vector<8x32xf32>
    %cst_91 = arith.constant 1.000000e+00 : f32
    %323 = vector.broadcast %cst_91 : f32 to vector<8x32xf32>
    %324 = arith.addf %323, %322 : vector<8x32xf32>
    %325 = arith.divf %323, %324 : vector<8x32xf32>
    %326 = arith.mulf %317, %247 : vector<8x32xf32>
    %327 = arith.mulf %311, %319 : vector<8x32xf32>
    %328 = arith.addf %326, %327 : vector<8x32xf32>
    %329 = math.tanh %328 : vector<8x32xf32>
    %330 = arith.mulf %325, %329 : vector<8x32xf32>
    %331 = arith.truncf %301 : vector<8x32xf32> to vector<8x32xbf16>
    %cst_92 = arith.constant dense<0.000000e+00> : vector<8x128xf32>
    %332 = tpu.matmul %331, %17, %cst_92 {dimension_numbers = #tpu.dot_dimension_numbers<[1], [0], [0], [1], [0, 0, 1, 1], [], []>} : vector<8x32xbf16>, vector<32x128xbf16>, vector<8x128xf32> -> vector<8x128xf32>
    %333 = vector.broadcast %19 : vector<1x128xf32> to vector<8x128xf32>
    %334 = arith.addf %332, %333 : vector<8x128xf32>
    %335 = arith.index_cast %c3_i32 : i32 to index
    %c0_93 = arith.constant 0 : index
    %c0_94 = arith.constant 0 : index
    %336 = vector.load %arg10[%335, %c0_93, %c0_94] : memref<8x8x128xf32, #tpu.memory_space<vmem>>, vector<1x8x128xf32>
    %337 = vector.shape_cast %336 : vector<1x8x128xf32> to vector<8x128xf32>
    %338 = vector.shape_cast %334 : vector<8x128xf32> to vector<1x8x128xf32>
    tpu.vector_store %arg10[%335, %c0_93, %c0_94], %338 {strides = array<i32>} : memref<8x8x128xf32, #tpu.memory_space<vmem>>, vector<1x8x128xf32>,
    %339 = arith.truncf %330 : vector<8x32xf32> to vector<8x32xbf16>
    %cst_95 = arith.constant dense<0.000000e+00> : vector<8x128xf32>
    %340 = tpu.matmul %339, %18, %cst_95 {dimension_numbers = #tpu.dot_dimension_numbers<[1], [0], [0], [1], [0, 0, 1, 1], [], []>} : vector<8x32xbf16>, vector<32x128xbf16>, vector<8x128xf32> -> vector<8x128xf32>
    %341 = arith.index_cast %264 : i32 to index
    %c0_96 = arith.constant 0 : index
    %c0_97 = arith.constant 0 : index
    %342 = vector.load %arg12[%341, %c0_96, %c0_97] : memref<8x8x128xf32, #tpu.memory_space<vmem>>, vector<1x8x128xf32>
    %343 = vector.shape_cast %342 : vector<1x8x128xf32> to vector<8x128xf32>
    %344 = vector.shape_cast %340 : vector<8x128xf32> to vector<1x8x128xf32>
    tpu.vector_store %arg12[%341, %c0_96, %c0_97], %344 {strides = array<i32>} : memref<8x8x128xf32, #tpu.memory_space<vmem>>, vector<1x8x128xf32>,
    %c4_i32 = arith.constant 4 : i32
    %c7_i32_98 = arith.constant 7 : i32
    %345 = arith.subi %c7_i32_98, %c4_i32 : i32
    %c8_i32_99 = arith.constant 8 : i32
    %346 = arith.muli %c4_i32, %c8_i32_99 : i32
    %347 = tpu.assume_multiple %346, 8 : i32
    %348 = arith.index_cast %347 : i32 to index
    %c0_100 = arith.constant 0 : index
    %349 = vector.load %arg11[%348, %c0_100] : memref<64x256xf32, #tpu.memory_space<vmem>>, vector<8x256xf32>
    %c8_i32_101 = arith.constant 8 : i32
    %350 = arith.muli %345, %c8_i32_101 : i32
    %351 = tpu.assume_multiple %350, 8 : i32
    %352 = arith.index_cast %351 : i32 to index
    %c0_102 = arith.constant 0 : index
    %353 = vector.load %arg11[%352, %c0_102] : memref<64x256xf32, #tpu.memory_space<vmem>>, vector<8x256xf32>
    %354 = vector.extract_strided_slice %349 {offsets = [0, 0], sizes = [8, 128], strides = [1, 1]} : vector<8x256xf32> to vector<8x128xf32>
    %355 = arith.truncf %301 : vector<8x32xf32> to vector<8x32xbf16>
    %cst_103 = arith.constant dense<0.000000e+00> : vector<8x128xf32>
    %356 = tpu.matmul %355, %15, %cst_103 {dimension_numbers = #tpu.dot_dimension_numbers<[1], [0], [0], [1], [0, 0, 1, 1], [], []>} : vector<8x32xbf16>, vector<32x128xbf16>, vector<8x128xf32> -> vector<8x128xf32>
    %357 = arith.addf %354, %356 : vector<8x128xf32>
    %358 = vector.extract_strided_slice %357 {offsets = [0, 0], sizes = [8, 32], strides = [1, 1]} : vector<8x128xf32> to vector<8x32xf32>
    %359 = arith.negf %358 : vector<8x32xf32>
    %360 = math.exp %359 : vector<8x32xf32>
    %cst_104 = arith.constant 1.000000e+00 : f32
    %361 = vector.broadcast %cst_104 : f32 to vector<8x32xf32>
    %362 = arith.addf %361, %360 : vector<8x32xf32>
    %363 = arith.divf %361, %362 : vector<8x32xf32>
    %364 = vector.extract_strided_slice %357 {offsets = [0, 32], sizes = [8, 32], strides = [1, 1]} : vector<8x128xf32> to vector<8x32xf32>
    %365 = arith.negf %364 : vector<8x32xf32>
    %366 = math.exp %365 : vector<8x32xf32>
    %cst_105 = arith.constant 1.000000e+00 : f32
    %367 = vector.broadcast %cst_105 : f32 to vector<8x32xf32>
    %368 = arith.addf %367, %366 : vector<8x32xf32>
    %369 = arith.divf %367, %368 : vector<8x32xf32>
    %370 = vector.extract_strided_slice %357 {offsets = [0, 64], sizes = [8, 32], strides = [1, 1]} : vector<8x128xf32> to vector<8x32xf32>
    %371 = math.tanh %370 : vector<8x32xf32>
    %372 = vector.extract_strided_slice %357 {offsets = [0, 96], sizes = [8, 32], strides = [1, 1]} : vector<8x128xf32> to vector<8x32xf32>
    %373 = arith.negf %372 : vector<8x32xf32>
    %374 = math.exp %373 : vector<8x32xf32>
    %cst_106 = arith.constant 1.000000e+00 : f32
    %375 = vector.broadcast %cst_106 : f32 to vector<8x32xf32>
    %376 = arith.addf %375, %374 : vector<8x32xf32>
    %377 = arith.divf %375, %376 : vector<8x32xf32>
    %378 = arith.mulf %369, %299 : vector<8x32xf32>
    %379 = arith.mulf %363, %371 : vector<8x32xf32>
    %380 = arith.addf %378, %379 : vector<8x32xf32>
    %381 = math.tanh %380 : vector<8x32xf32>
    %382 = arith.mulf %377, %381 : vector<8x32xf32>
    %383 = vector.extract_strided_slice %353 {offsets = [0, 128], sizes = [8, 128], strides = [1, 1]} : vector<8x256xf32> to vector<8x128xf32>
    %384 = arith.truncf %330 : vector<8x32xf32> to vector<8x32xbf16>
    %cst_107 = arith.constant dense<0.000000e+00> : vector<8x128xf32>
    %385 = tpu.matmul %384, %16, %cst_107 {dimension_numbers = #tpu.dot_dimension_numbers<[1], [0], [0], [1], [0, 0, 1, 1], [], []>} : vector<8x32xbf16>, vector<32x128xbf16>, vector<8x128xf32> -> vector<8x128xf32>
    %386 = arith.addf %383, %385 : vector<8x128xf32>
    %387 = vector.extract_strided_slice %386 {offsets = [0, 0], sizes = [8, 32], strides = [1, 1]} : vector<8x128xf32> to vector<8x32xf32>
    %388 = arith.negf %387 : vector<8x32xf32>
    %389 = math.exp %388 : vector<8x32xf32>
    %cst_108 = arith.constant 1.000000e+00 : f32
    %390 = vector.broadcast %cst_108 : f32 to vector<8x32xf32>
    %391 = arith.addf %390, %389 : vector<8x32xf32>
    %392 = arith.divf %390, %391 : vector<8x32xf32>
    %393 = vector.extract_strided_slice %386 {offsets = [0, 32], sizes = [8, 32], strides = [1, 1]} : vector<8x128xf32> to vector<8x32xf32>
    %394 = arith.negf %393 : vector<8x32xf32>
    %395 = math.exp %394 : vector<8x32xf32>
    %cst_109 = arith.constant 1.000000e+00 : f32
    %396 = vector.broadcast %cst_109 : f32 to vector<8x32xf32>
    %397 = arith.addf %396, %395 : vector<8x32xf32>
    %398 = arith.divf %396, %397 : vector<8x32xf32>
    %399 = vector.extract_strided_slice %386 {offsets = [0, 64], sizes = [8, 32], strides = [1, 1]} : vector<8x128xf32> to vector<8x32xf32>
    %400 = math.tanh %399 : vector<8x32xf32>
    %401 = vector.extract_strided_slice %386 {offsets = [0, 96], sizes = [8, 32], strides = [1, 1]} : vector<8x128xf32> to vector<8x32xf32>
    %402 = arith.negf %401 : vector<8x32xf32>
    %403 = math.exp %402 : vector<8x32xf32>
    %cst_110 = arith.constant 1.000000e+00 : f32
    %404 = vector.broadcast %cst_110 : f32 to vector<8x32xf32>
    %405 = arith.addf %404, %403 : vector<8x32xf32>
    %406 = arith.divf %404, %405 : vector<8x32xf32>
    %407 = arith.mulf %398, %328 : vector<8x32xf32>
    %408 = arith.mulf %392, %400 : vector<8x32xf32>
    %409 = arith.addf %407, %408 : vector<8x32xf32>
    %410 = math.tanh %409 : vector<8x32xf32>
    %411 = arith.mulf %406, %410 : vector<8x32xf32>
    %412 = arith.truncf %382 : vector<8x32xf32> to vector<8x32xbf16>
    %cst_111 = arith.constant dense<0.000000e+00> : vector<8x128xf32>
    %413 = tpu.matmul %412, %17, %cst_111 {dimension_numbers = #tpu.dot_dimension_numbers<[1], [0], [0], [1], [0, 0, 1, 1], [], []>} : vector<8x32xbf16>, vector<32x128xbf16>, vector<8x128xf32> -> vector<8x128xf32>
    %414 = vector.broadcast %19 : vector<1x128xf32> to vector<8x128xf32>
    %415 = arith.addf %413, %414 : vector<8x128xf32>
    %416 = arith.index_cast %c4_i32 : i32 to index
    %c0_112 = arith.constant 0 : index
    %c0_113 = arith.constant 0 : index
    %417 = vector.load %arg10[%416, %c0_112, %c0_113] : memref<8x8x128xf32, #tpu.memory_space<vmem>>, vector<1x8x128xf32>
    %418 = vector.shape_cast %417 : vector<1x8x128xf32> to vector<8x128xf32>
    %419 = vector.shape_cast %415 : vector<8x128xf32> to vector<1x8x128xf32>
    tpu.vector_store %arg10[%416, %c0_112, %c0_113], %419 {strides = array<i32>} : memref<8x8x128xf32, #tpu.memory_space<vmem>>, vector<1x8x128xf32>,
    %420 = arith.truncf %411 : vector<8x32xf32> to vector<8x32xbf16>
    %cst_114 = arith.constant dense<0.000000e+00> : vector<8x128xf32>
    %421 = tpu.matmul %420, %18, %cst_114 {dimension_numbers = #tpu.dot_dimension_numbers<[1], [0], [0], [1], [0, 0, 1, 1], [], []>} : vector<8x32xbf16>, vector<32x128xbf16>, vector<8x128xf32> -> vector<8x128xf32>
    %422 = arith.index_cast %345 : i32 to index
    %c0_115 = arith.constant 0 : index
    %c0_116 = arith.constant 0 : index
    %423 = vector.load %arg12[%422, %c0_115, %c0_116] : memref<8x8x128xf32, #tpu.memory_space<vmem>>, vector<1x8x128xf32>
    %424 = vector.shape_cast %423 : vector<1x8x128xf32> to vector<8x128xf32>
    %425 = vector.shape_cast %421 : vector<8x128xf32> to vector<1x8x128xf32>
    tpu.vector_store %arg12[%422, %c0_115, %c0_116], %425 {strides = array<i32>} : memref<8x8x128xf32, #tpu.memory_space<vmem>>, vector<1x8x128xf32>,
    %c5_i32 = arith.constant 5 : i32
    %c7_i32_117 = arith.constant 7 : i32
    %426 = arith.subi %c7_i32_117, %c5_i32 : i32
    %c8_i32_118 = arith.constant 8 : i32
    %427 = arith.muli %c5_i32, %c8_i32_118 : i32
    %428 = tpu.assume_multiple %427, 8 : i32
    %429 = arith.index_cast %428 : i32 to index
    %c0_119 = arith.constant 0 : index
    %430 = vector.load %arg11[%429, %c0_119] : memref<64x256xf32, #tpu.memory_space<vmem>>, vector<8x256xf32>
    %c8_i32_120 = arith.constant 8 : i32
    %431 = arith.muli %426, %c8_i32_120 : i32
    %432 = tpu.assume_multiple %431, 8 : i32
    %433 = arith.index_cast %432 : i32 to index
    %c0_121 = arith.constant 0 : index
    %434 = vector.load %arg11[%433, %c0_121] : memref<64x256xf32, #tpu.memory_space<vmem>>, vector<8x256xf32>
    %435 = vector.extract_strided_slice %430 {offsets = [0, 0], sizes = [8, 128], strides = [1, 1]} : vector<8x256xf32> to vector<8x128xf32>
    %436 = arith.truncf %382 : vector<8x32xf32> to vector<8x32xbf16>
    %cst_122 = arith.constant dense<0.000000e+00> : vector<8x128xf32>
    %437 = tpu.matmul %436, %15, %cst_122 {dimension_numbers = #tpu.dot_dimension_numbers<[1], [0], [0], [1], [0, 0, 1, 1], [], []>} : vector<8x32xbf16>, vector<32x128xbf16>, vector<8x128xf32> -> vector<8x128xf32>
    %438 = arith.addf %435, %437 : vector<8x128xf32>
    %439 = vector.extract_strided_slice %438 {offsets = [0, 0], sizes = [8, 32], strides = [1, 1]} : vector<8x128xf32> to vector<8x32xf32>
    %440 = arith.negf %439 : vector<8x32xf32>
    %441 = math.exp %440 : vector<8x32xf32>
    %cst_123 = arith.constant 1.000000e+00 : f32
    %442 = vector.broadcast %cst_123 : f32 to vector<8x32xf32>
    %443 = arith.addf %442, %441 : vector<8x32xf32>
    %444 = arith.divf %442, %443 : vector<8x32xf32>
    %445 = vector.extract_strided_slice %438 {offsets = [0, 32], sizes = [8, 32], strides = [1, 1]} : vector<8x128xf32> to vector<8x32xf32>
    %446 = arith.negf %445 : vector<8x32xf32>
    %447 = math.exp %446 : vector<8x32xf32>
    %cst_124 = arith.constant 1.000000e+00 : f32
    %448 = vector.broadcast %cst_124 : f32 to vector<8x32xf32>
    %449 = arith.addf %448, %447 : vector<8x32xf32>
    %450 = arith.divf %448, %449 : vector<8x32xf32>
    %451 = vector.extract_strided_slice %438 {offsets = [0, 64], sizes = [8, 32], strides = [1, 1]} : vector<8x128xf32> to vector<8x32xf32>
    %452 = math.tanh %451 : vector<8x32xf32>
    %453 = vector.extract_strided_slice %438 {offsets = [0, 96], sizes = [8, 32], strides = [1, 1]} : vector<8x128xf32> to vector<8x32xf32>
    %454 = arith.negf %453 : vector<8x32xf32>
    %455 = math.exp %454 : vector<8x32xf32>
    %cst_125 = arith.constant 1.000000e+00 : f32
    %456 = vector.broadcast %cst_125 : f32 to vector<8x32xf32>
    %457 = arith.addf %456, %455 : vector<8x32xf32>
    %458 = arith.divf %456, %457 : vector<8x32xf32>
    %459 = arith.mulf %450, %380 : vector<8x32xf32>
    %460 = arith.mulf %444, %452 : vector<8x32xf32>
    %461 = arith.addf %459, %460 : vector<8x32xf32>
    %462 = math.tanh %461 : vector<8x32xf32>
    %463 = arith.mulf %458, %462 : vector<8x32xf32>
    %464 = vector.extract_strided_slice %434 {offsets = [0, 128], sizes = [8, 128], strides = [1, 1]} : vector<8x256xf32> to vector<8x128xf32>
    %465 = arith.truncf %411 : vector<8x32xf32> to vector<8x32xbf16>
    %cst_126 = arith.constant dense<0.000000e+00> : vector<8x128xf32>
    %466 = tpu.matmul %465, %16, %cst_126 {dimension_numbers = #tpu.dot_dimension_numbers<[1], [0], [0], [1], [0, 0, 1, 1], [], []>} : vector<8x32xbf16>, vector<32x128xbf16>, vector<8x128xf32> -> vector<8x128xf32>
    %467 = arith.addf %464, %466 : vector<8x128xf32>
    %468 = vector.extract_strided_slice %467 {offsets = [0, 0], sizes = [8, 32], strides = [1, 1]} : vector<8x128xf32> to vector<8x32xf32>
    %469 = arith.negf %468 : vector<8x32xf32>
    %470 = math.exp %469 : vector<8x32xf32>
    %cst_127 = arith.constant 1.000000e+00 : f32
    %471 = vector.broadcast %cst_127 : f32 to vector<8x32xf32>
    %472 = arith.addf %471, %470 : vector<8x32xf32>
    %473 = arith.divf %471, %472 : vector<8x32xf32>
    %474 = vector.extract_strided_slice %467 {offsets = [0, 32], sizes = [8, 32], strides = [1, 1]} : vector<8x128xf32> to vector<8x32xf32>
    %475 = arith.negf %474 : vector<8x32xf32>
    %476 = math.exp %475 : vector<8x32xf32>
    %cst_128 = arith.constant 1.000000e+00 : f32
    %477 = vector.broadcast %cst_128 : f32 to vector<8x32xf32>
    %478 = arith.addf %477, %476 : vector<8x32xf32>
    %479 = arith.divf %477, %478 : vector<8x32xf32>
    %480 = vector.extract_strided_slice %467 {offsets = [0, 64], sizes = [8, 32], strides = [1, 1]} : vector<8x128xf32> to vector<8x32xf32>
    %481 = math.tanh %480 : vector<8x32xf32>
    %482 = vector.extract_strided_slice %467 {offsets = [0, 96], sizes = [8, 32], strides = [1, 1]} : vector<8x128xf32> to vector<8x32xf32>
    %483 = arith.negf %482 : vector<8x32xf32>
    %484 = math.exp %483 : vector<8x32xf32>
    %cst_129 = arith.constant 1.000000e+00 : f32
    %485 = vector.broadcast %cst_129 : f32 to vector<8x32xf32>
    %486 = arith.addf %485, %484 : vector<8x32xf32>
    %487 = arith.divf %485, %486 : vector<8x32xf32>
    %488 = arith.mulf %479, %409 : vector<8x32xf32>
    %489 = arith.mulf %473, %481 : vector<8x32xf32>
    %490 = arith.addf %488, %489 : vector<8x32xf32>
    %491 = math.tanh %490 : vector<8x32xf32>
    %492 = arith.mulf %487, %491 : vector<8x32xf32>
    %493 = arith.truncf %463 : vector<8x32xf32> to vector<8x32xbf16>
    %cst_130 = arith.constant dense<0.000000e+00> : vector<8x128xf32>
    %494 = tpu.matmul %493, %17, %cst_130 {dimension_numbers = #tpu.dot_dimension_numbers<[1], [0], [0], [1], [0, 0, 1, 1], [], []>} : vector<8x32xbf16>, vector<32x128xbf16>, vector<8x128xf32> -> vector<8x128xf32>
    %495 = vector.broadcast %19 : vector<1x128xf32> to vector<8x128xf32>
    %496 = arith.addf %494, %495 : vector<8x128xf32>
    %497 = arith.index_cast %c5_i32 : i32 to index
    %c0_131 = arith.constant 0 : index
    %c0_132 = arith.constant 0 : index
    %498 = vector.load %arg10[%497, %c0_131, %c0_132] : memref<8x8x128xf32, #tpu.memory_space<vmem>>, vector<1x8x128xf32>
    %499 = vector.shape_cast %498 : vector<1x8x128xf32> to vector<8x128xf32>
    %500 = vector.shape_cast %496 : vector<8x128xf32> to vector<1x8x128xf32>
    tpu.vector_store %arg10[%497, %c0_131, %c0_132], %500 {strides = array<i32>} : memref<8x8x128xf32, #tpu.memory_space<vmem>>, vector<1x8x128xf32>,
    %501 = arith.truncf %492 : vector<8x32xf32> to vector<8x32xbf16>
    %cst_133 = arith.constant dense<0.000000e+00> : vector<8x128xf32>
    %502 = tpu.matmul %501, %18, %cst_133 {dimension_numbers = #tpu.dot_dimension_numbers<[1], [0], [0], [1], [0, 0, 1, 1], [], []>} : vector<8x32xbf16>, vector<32x128xbf16>, vector<8x128xf32> -> vector<8x128xf32>
    %503 = arith.index_cast %426 : i32 to index
    %c0_134 = arith.constant 0 : index
    %c0_135 = arith.constant 0 : index
    %504 = vector.load %arg12[%503, %c0_134, %c0_135] : memref<8x8x128xf32, #tpu.memory_space<vmem>>, vector<1x8x128xf32>
    %505 = vector.shape_cast %504 : vector<1x8x128xf32> to vector<8x128xf32>
    %506 = vector.shape_cast %502 : vector<8x128xf32> to vector<1x8x128xf32>
    tpu.vector_store %arg12[%503, %c0_134, %c0_135], %506 {strides = array<i32>} : memref<8x8x128xf32, #tpu.memory_space<vmem>>, vector<1x8x128xf32>,
    %c6_i32 = arith.constant 6 : i32
    %c7_i32_136 = arith.constant 7 : i32
    %507 = arith.subi %c7_i32_136, %c6_i32 : i32
    %c8_i32_137 = arith.constant 8 : i32
    %508 = arith.muli %c6_i32, %c8_i32_137 : i32
    %509 = tpu.assume_multiple %508, 8 : i32
    %510 = arith.index_cast %509 : i32 to index
    %c0_138 = arith.constant 0 : index
    %511 = vector.load %arg11[%510, %c0_138] : memref<64x256xf32, #tpu.memory_space<vmem>>, vector<8x256xf32>
    %c8_i32_139 = arith.constant 8 : i32
    %512 = arith.muli %507, %c8_i32_139 : i32
    %513 = tpu.assume_multiple %512, 8 : i32
    %514 = arith.index_cast %513 : i32 to index
    %c0_140 = arith.constant 0 : index
    %515 = vector.load %arg11[%514, %c0_140] : memref<64x256xf32, #tpu.memory_space<vmem>>, vector<8x256xf32>
    %516 = vector.extract_strided_slice %511 {offsets = [0, 0], sizes = [8, 128], strides = [1, 1]} : vector<8x256xf32> to vector<8x128xf32>
    %517 = arith.truncf %463 : vector<8x32xf32> to vector<8x32xbf16>
    %cst_141 = arith.constant dense<0.000000e+00> : vector<8x128xf32>
    %518 = tpu.matmul %517, %15, %cst_141 {dimension_numbers = #tpu.dot_dimension_numbers<[1], [0], [0], [1], [0, 0, 1, 1], [], []>} : vector<8x32xbf16>, vector<32x128xbf16>, vector<8x128xf32> -> vector<8x128xf32>
    %519 = arith.addf %516, %518 : vector<8x128xf32>
    %520 = vector.extract_strided_slice %519 {offsets = [0, 0], sizes = [8, 32], strides = [1, 1]} : vector<8x128xf32> to vector<8x32xf32>
    %521 = arith.negf %520 : vector<8x32xf32>
    %522 = math.exp %521 : vector<8x32xf32>
    %cst_142 = arith.constant 1.000000e+00 : f32
    %523 = vector.broadcast %cst_142 : f32 to vector<8x32xf32>
    %524 = arith.addf %523, %522 : vector<8x32xf32>
    %525 = arith.divf %523, %524 : vector<8x32xf32>
    %526 = vector.extract_strided_slice %519 {offsets = [0, 32], sizes = [8, 32], strides = [1, 1]} : vector<8x128xf32> to vector<8x32xf32>
    %527 = arith.negf %526 : vector<8x32xf32>
    %528 = math.exp %527 : vector<8x32xf32>
    %cst_143 = arith.constant 1.000000e+00 : f32
    %529 = vector.broadcast %cst_143 : f32 to vector<8x32xf32>
    %530 = arith.addf %529, %528 : vector<8x32xf32>
    %531 = arith.divf %529, %530 : vector<8x32xf32>
    %532 = vector.extract_strided_slice %519 {offsets = [0, 64], sizes = [8, 32], strides = [1, 1]} : vector<8x128xf32> to vector<8x32xf32>
    %533 = math.tanh %532 : vector<8x32xf32>
    %534 = vector.extract_strided_slice %519 {offsets = [0, 96], sizes = [8, 32], strides = [1, 1]} : vector<8x128xf32> to vector<8x32xf32>
    %535 = arith.negf %534 : vector<8x32xf32>
    %536 = math.exp %535 : vector<8x32xf32>
    %cst_144 = arith.constant 1.000000e+00 : f32
    %537 = vector.broadcast %cst_144 : f32 to vector<8x32xf32>
    %538 = arith.addf %537, %536 : vector<8x32xf32>
    %539 = arith.divf %537, %538 : vector<8x32xf32>
    %540 = arith.mulf %531, %461 : vector<8x32xf32>
    %541 = arith.mulf %525, %533 : vector<8x32xf32>
    %542 = arith.addf %540, %541 : vector<8x32xf32>
    %543 = math.tanh %542 : vector<8x32xf32>
    %544 = arith.mulf %539, %543 : vector<8x32xf32>
    %545 = vector.extract_strided_slice %515 {offsets = [0, 128], sizes = [8, 128], strides = [1, 1]} : vector<8x256xf32> to vector<8x128xf32>
    %546 = arith.truncf %492 : vector<8x32xf32> to vector<8x32xbf16>
    %cst_145 = arith.constant dense<0.000000e+00> : vector<8x128xf32>
    %547 = tpu.matmul %546, %16, %cst_145 {dimension_numbers = #tpu.dot_dimension_numbers<[1], [0], [0], [1], [0, 0, 1, 1], [], []>} : vector<8x32xbf16>, vector<32x128xbf16>, vector<8x128xf32> -> vector<8x128xf32>
    %548 = arith.addf %545, %547 : vector<8x128xf32>
    %549 = vector.extract_strided_slice %548 {offsets = [0, 0], sizes = [8, 32], strides = [1, 1]} : vector<8x128xf32> to vector<8x32xf32>
    %550 = arith.negf %549 : vector<8x32xf32>
    %551 = math.exp %550 : vector<8x32xf32>
    %cst_146 = arith.constant 1.000000e+00 : f32
    %552 = vector.broadcast %cst_146 : f32 to vector<8x32xf32>
    %553 = arith.addf %552, %551 : vector<8x32xf32>
    %554 = arith.divf %552, %553 : vector<8x32xf32>
    %555 = vector.extract_strided_slice %548 {offsets = [0, 32], sizes = [8, 32], strides = [1, 1]} : vector<8x128xf32> to vector<8x32xf32>
    %556 = arith.negf %555 : vector<8x32xf32>
    %557 = math.exp %556 : vector<8x32xf32>
    %cst_147 = arith.constant 1.000000e+00 : f32
    %558 = vector.broadcast %cst_147 : f32 to vector<8x32xf32>
    %559 = arith.addf %558, %557 : vector<8x32xf32>
    %560 = arith.divf %558, %559 : vector<8x32xf32>
    %561 = vector.extract_strided_slice %548 {offsets = [0, 64], sizes = [8, 32], strides = [1, 1]} : vector<8x128xf32> to vector<8x32xf32>
    %562 = math.tanh %561 : vector<8x32xf32>
    %563 = vector.extract_strided_slice %548 {offsets = [0, 96], sizes = [8, 32], strides = [1, 1]} : vector<8x128xf32> to vector<8x32xf32>
    %564 = arith.negf %563 : vector<8x32xf32>
    %565 = math.exp %564 : vector<8x32xf32>
    %cst_148 = arith.constant 1.000000e+00 : f32
    %566 = vector.broadcast %cst_148 : f32 to vector<8x32xf32>
    %567 = arith.addf %566, %565 : vector<8x32xf32>
    %568 = arith.divf %566, %567 : vector<8x32xf32>
    %569 = arith.mulf %560, %490 : vector<8x32xf32>
    %570 = arith.mulf %554, %562 : vector<8x32xf32>
    %571 = arith.addf %569, %570 : vector<8x32xf32>
    %572 = math.tanh %571 : vector<8x32xf32>
    %573 = arith.mulf %568, %572 : vector<8x32xf32>
    %574 = arith.truncf %544 : vector<8x32xf32> to vector<8x32xbf16>
    %cst_149 = arith.constant dense<0.000000e+00> : vector<8x128xf32>
    %575 = tpu.matmul %574, %17, %cst_149 {dimension_numbers = #tpu.dot_dimension_numbers<[1], [0], [0], [1], [0, 0, 1, 1], [], []>} : vector<8x32xbf16>, vector<32x128xbf16>, vector<8x128xf32> -> vector<8x128xf32>
    %576 = vector.broadcast %19 : vector<1x128xf32> to vector<8x128xf32>
    %577 = arith.addf %575, %576 : vector<8x128xf32>
    %578 = arith.index_cast %c6_i32 : i32 to index
    %c0_150 = arith.constant 0 : index
    %c0_151 = arith.constant 0 : index
    %579 = vector.load %arg10[%578, %c0_150, %c0_151] : memref<8x8x128xf32, #tpu.memory_space<vmem>>, vector<1x8x128xf32>
    %580 = vector.shape_cast %579 : vector<1x8x128xf32> to vector<8x128xf32>
    %581 = vector.shape_cast %577 : vector<8x128xf32> to vector<1x8x128xf32>
    tpu.vector_store %arg10[%578, %c0_150, %c0_151], %581 {strides = array<i32>} : memref<8x8x128xf32, #tpu.memory_space<vmem>>, vector<1x8x128xf32>,
    %582 = arith.truncf %573 : vector<8x32xf32> to vector<8x32xbf16>
    %cst_152 = arith.constant dense<0.000000e+00> : vector<8x128xf32>
    %583 = tpu.matmul %582, %18, %cst_152 {dimension_numbers = #tpu.dot_dimension_numbers<[1], [0], [0], [1], [0, 0, 1, 1], [], []>} : vector<8x32xbf16>, vector<32x128xbf16>, vector<8x128xf32> -> vector<8x128xf32>
    %584 = arith.index_cast %507 : i32 to index
    %c0_153 = arith.constant 0 : index
    %c0_154 = arith.constant 0 : index
    %585 = vector.load %arg12[%584, %c0_153, %c0_154] : memref<8x8x128xf32, #tpu.memory_space<vmem>>, vector<1x8x128xf32>
    %586 = vector.shape_cast %585 : vector<1x8x128xf32> to vector<8x128xf32>
    %587 = vector.shape_cast %583 : vector<8x128xf32> to vector<1x8x128xf32>
    tpu.vector_store %arg12[%584, %c0_153, %c0_154], %587 {strides = array<i32>} : memref<8x8x128xf32, #tpu.memory_space<vmem>>, vector<1x8x128xf32>,
    %c7_i32_155 = arith.constant 7 : i32
    %c7_i32_156 = arith.constant 7 : i32
    %588 = arith.subi %c7_i32_156, %c7_i32_155 : i32
    %c8_i32_157 = arith.constant 8 : i32
    %589 = arith.muli %c7_i32_155, %c8_i32_157 : i32
    %590 = tpu.assume_multiple %589, 8 : i32
    %591 = arith.index_cast %590 : i32 to index
    %c0_158 = arith.constant 0 : index
    %592 = vector.load %arg11[%591, %c0_158] : memref<64x256xf32, #tpu.memory_space<vmem>>, vector<8x256xf32>
    %c8_i32_159 = arith.constant 8 : i32
    %593 = arith.muli %588, %c8_i32_159 : i32
    %594 = tpu.assume_multiple %593, 8 : i32
    %595 = arith.index_cast %594 : i32 to index
    %c0_160 = arith.constant 0 : index
    %596 = vector.load %arg11[%595, %c0_160] : memref<64x256xf32, #tpu.memory_space<vmem>>, vector<8x256xf32>
    %597 = vector.extract_strided_slice %592 {offsets = [0, 0], sizes = [8, 128], strides = [1, 1]} : vector<8x256xf32> to vector<8x128xf32>
    %598 = arith.truncf %544 : vector<8x32xf32> to vector<8x32xbf16>
    %cst_161 = arith.constant dense<0.000000e+00> : vector<8x128xf32>
    %599 = tpu.matmul %598, %15, %cst_161 {dimension_numbers = #tpu.dot_dimension_numbers<[1], [0], [0], [1], [0, 0, 1, 1], [], []>} : vector<8x32xbf16>, vector<32x128xbf16>, vector<8x128xf32> -> vector<8x128xf32>
    %600 = arith.addf %597, %599 : vector<8x128xf32>
    %601 = vector.extract_strided_slice %600 {offsets = [0, 0], sizes = [8, 32], strides = [1, 1]} : vector<8x128xf32> to vector<8x32xf32>
    %602 = arith.negf %601 : vector<8x32xf32>
    %603 = math.exp %602 : vector<8x32xf32>
    %cst_162 = arith.constant 1.000000e+00 : f32
    %604 = vector.broadcast %cst_162 : f32 to vector<8x32xf32>
    %605 = arith.addf %604, %603 : vector<8x32xf32>
    %606 = arith.divf %604, %605 : vector<8x32xf32>
    %607 = vector.extract_strided_slice %600 {offsets = [0, 32], sizes = [8, 32], strides = [1, 1]} : vector<8x128xf32> to vector<8x32xf32>
    %608 = arith.negf %607 : vector<8x32xf32>
    %609 = math.exp %608 : vector<8x32xf32>
    %cst_163 = arith.constant 1.000000e+00 : f32
    %610 = vector.broadcast %cst_163 : f32 to vector<8x32xf32>
    %611 = arith.addf %610, %609 : vector<8x32xf32>
    %612 = arith.divf %610, %611 : vector<8x32xf32>
    %613 = vector.extract_strided_slice %600 {offsets = [0, 64], sizes = [8, 32], strides = [1, 1]} : vector<8x128xf32> to vector<8x32xf32>
    %614 = math.tanh %613 : vector<8x32xf32>
    %615 = vector.extract_strided_slice %600 {offsets = [0, 96], sizes = [8, 32], strides = [1, 1]} : vector<8x128xf32> to vector<8x32xf32>
    %616 = arith.negf %615 : vector<8x32xf32>
    %617 = math.exp %616 : vector<8x32xf32>
    %cst_164 = arith.constant 1.000000e+00 : f32
    %618 = vector.broadcast %cst_164 : f32 to vector<8x32xf32>
    %619 = arith.addf %618, %617 : vector<8x32xf32>
    %620 = arith.divf %618, %619 : vector<8x32xf32>
    %621 = arith.mulf %612, %542 : vector<8x32xf32>
    %622 = arith.mulf %606, %614 : vector<8x32xf32>
    %623 = arith.addf %621, %622 : vector<8x32xf32>
    %624 = math.tanh %623 : vector<8x32xf32>
    %625 = arith.mulf %620, %624 : vector<8x32xf32>
    %626 = vector.extract_strided_slice %596 {offsets = [0, 128], sizes = [8, 128], strides = [1, 1]} : vector<8x256xf32> to vector<8x128xf32>
    %627 = arith.truncf %573 : vector<8x32xf32> to vector<8x32xbf16>
    %cst_165 = arith.constant dense<0.000000e+00> : vector<8x128xf32>
    %628 = tpu.matmul %627, %16, %cst_165 {dimension_numbers = #tpu.dot_dimension_numbers<[1], [0], [0], [1], [0, 0, 1, 1], [], []>} : vector<8x32xbf16>, vector<32x128xbf16>, vector<8x128xf32> -> vector<8x128xf32>
    %629 = arith.addf %626, %628 : vector<8x128xf32>
    %630 = vector.extract_strided_slice %629 {offsets = [0, 0], sizes = [8, 32], strides = [1, 1]} : vector<8x128xf32> to vector<8x32xf32>
    %631 = arith.negf %630 : vector<8x32xf32>
    %632 = math.exp %631 : vector<8x32xf32>
    %cst_166 = arith.constant 1.000000e+00 : f32
    %633 = vector.broadcast %cst_166 : f32 to vector<8x32xf32>
    %634 = arith.addf %633, %632 : vector<8x32xf32>
    %635 = arith.divf %633, %634 : vector<8x32xf32>
    %636 = vector.extract_strided_slice %629 {offsets = [0, 32], sizes = [8, 32], strides = [1, 1]} : vector<8x128xf32> to vector<8x32xf32>
    %637 = arith.negf %636 : vector<8x32xf32>
    %638 = math.exp %637 : vector<8x32xf32>
    %cst_167 = arith.constant 1.000000e+00 : f32
    %639 = vector.broadcast %cst_167 : f32 to vector<8x32xf32>
    %640 = arith.addf %639, %638 : vector<8x32xf32>
    %641 = arith.divf %639, %640 : vector<8x32xf32>
    %642 = vector.extract_strided_slice %629 {offsets = [0, 64], sizes = [8, 32], strides = [1, 1]} : vector<8x128xf32> to vector<8x32xf32>
    %643 = math.tanh %642 : vector<8x32xf32>
    %644 = vector.extract_strided_slice %629 {offsets = [0, 96], sizes = [8, 32], strides = [1, 1]} : vector<8x128xf32> to vector<8x32xf32>
    %645 = arith.negf %644 : vector<8x32xf32>
    %646 = math.exp %645 : vector<8x32xf32>
    %cst_168 = arith.constant 1.000000e+00 : f32
    %647 = vector.broadcast %cst_168 : f32 to vector<8x32xf32>
    %648 = arith.addf %647, %646 : vector<8x32xf32>
    %649 = arith.divf %647, %648 : vector<8x32xf32>
    %650 = arith.mulf %641, %571 : vector<8x32xf32>
    %651 = arith.mulf %635, %643 : vector<8x32xf32>
    %652 = arith.addf %650, %651 : vector<8x32xf32>
    %653 = math.tanh %652 : vector<8x32xf32>
    %654 = arith.mulf %649, %653 : vector<8x32xf32>
    %655 = arith.truncf %625 : vector<8x32xf32> to vector<8x32xbf16>
    %cst_169 = arith.constant dense<0.000000e+00> : vector<8x128xf32>
    %656 = tpu.matmul %655, %17, %cst_169 {dimension_numbers = #tpu.dot_dimension_numbers<[1], [0], [0], [1], [0, 0, 1, 1], [], []>} : vector<8x32xbf16>, vector<32x128xbf16>, vector<8x128xf32> -> vector<8x128xf32>
    %657 = vector.broadcast %19 : vector<1x128xf32> to vector<8x128xf32>
    %658 = arith.addf %656, %657 : vector<8x128xf32>
    %659 = arith.index_cast %c7_i32_155 : i32 to index
    %c0_170 = arith.constant 0 : index
    %c0_171 = arith.constant 0 : index
    %660 = vector.load %arg10[%659, %c0_170, %c0_171] : memref<8x8x128xf32, #tpu.memory_space<vmem>>, vector<1x8x128xf32>
    %661 = vector.shape_cast %660 : vector<1x8x128xf32> to vector<8x128xf32>
    %662 = vector.shape_cast %658 : vector<8x128xf32> to vector<1x8x128xf32>
    tpu.vector_store %arg10[%659, %c0_170, %c0_171], %662 {strides = array<i32>} : memref<8x8x128xf32, #tpu.memory_space<vmem>>, vector<1x8x128xf32>,
    %663 = arith.truncf %654 : vector<8x32xf32> to vector<8x32xbf16>
    %cst_172 = arith.constant dense<0.000000e+00> : vector<8x128xf32>
    %664 = tpu.matmul %663, %18, %cst_172 {dimension_numbers = #tpu.dot_dimension_numbers<[1], [0], [0], [1], [0, 0, 1, 1], [], []>} : vector<8x32xbf16>, vector<32x128xbf16>, vector<8x128xf32> -> vector<8x128xf32>
    %665 = arith.index_cast %588 : i32 to index
    %c0_173 = arith.constant 0 : index
    %c0_174 = arith.constant 0 : index
    %666 = vector.load %arg12[%665, %c0_173, %c0_174] : memref<8x8x128xf32, #tpu.memory_space<vmem>>, vector<1x8x128xf32>
    %667 = vector.shape_cast %666 : vector<1x8x128xf32> to vector<8x128xf32>
    %668 = vector.shape_cast %664 : vector<8x128xf32> to vector<1x8x128xf32>
    tpu.vector_store %arg12[%665, %c0_173, %c0_174], %668 {strides = array<i32>} : memref<8x8x128xf32, #tpu.memory_space<vmem>>, vector<1x8x128xf32>,
    %c8_i32_175 = arith.constant 8 : i32
    %c0_176 = arith.constant 0 : index
    %c0_177 = arith.constant 0 : index
    %c0_178 = arith.constant 0 : index
    %669 = vector.load %arg10[%c0_176, %c0_177, %c0_178] : memref<8x8x128xf32, #tpu.memory_space<vmem>>, vector<8x8x128xf32>
    %c0_179 = arith.constant 0 : index
    %c0_180 = arith.constant 0 : index
    %c0_181 = arith.constant 0 : index
    %670 = vector.load %arg12[%c0_179, %c0_180, %c0_181] : memref<8x8x128xf32, #tpu.memory_space<vmem>>, vector<8x8x128xf32>
    %671 = arith.addf %669, %670 : vector<8x8x128xf32>
    %c0_182 = arith.constant 0 : index
    %c0_183 = arith.constant 0 : index
    %c0_184 = arith.constant 0 : index
    %672 = vector.load %arg10[%c0_182, %c0_183, %c0_184] : memref<8x8x128xf32, #tpu.memory_space<vmem>>, vector<8x8x128xf32>
    tpu.vector_store %arg10[%c0_182, %c0_183, %c0_184], %671 {strides = array<i32>} : memref<8x8x128xf32, #tpu.memory_space<vmem>>, vector<8x8x128xf32>,
    return
  }
}

</mosaic_0001>

<bundles_post_ra>
// kernel: _forward_core.1
= control target key start
LH: loop header
LB: loop body
LE: loop exit
PB: predicated region body
PF: predicated region fallthrough
CT: control target
= control target key end

     0   :  { %vm87_vm0 = vcmask 261120   ;;  %v2906_v9 = vmov 0.0   ;;  %v2907_v13 = vmov 0   ;;  %vm2908_vm1 = vmmov 0   ;;  %s2910_s21 = smov 32   ;;  %s3531_s1 = inlined_call_operand.vmem [shape: bf16[32,32], index: 1, kind: input, shape index: {}]   ;;  %s3532_s0 = inlined_call_operand.vmem [shape: bf16[64,32], index: 0, kind: input, shape index: {}]   ;;  %s3533_s3 = inlined_call_operand.vmem [shape: bf16[32,256], index: 3, kind: input, shape index: {}]   ;;  %s3534_s5 = inlined_call_operand.vmem [shape: bf16[32,128], index: 5, kind: input, shape index: {}]   ;;  %s3535_s6 = inlined_call_operand.vmem [shape: bf16[32,128], index: 6, kind: input, shape index: {}]   ;;  %s3536_s2 = inlined_call_operand.vmem [shape: f32[1,32], index: 2, kind: input, shape index: {}]   ;;  %s3537_s4 = inlined_call_operand.vmem [shape: f32[1,256], index: 4, kind: input, shape index: {}]   ;;  %s3538_s7 = inlined_call_operand.vmem [shape: bf16[32,128], index: 7, kind: input, shape index: {}]   ;;  %s3539_s8 = inlined_call_operand.vmem [shape: bf16[32,128], index: 8, kind: input, shape index: {}]   ;;  %s3540_s9 = inlined_call_operand.vmem [shape: f32[1,128], index: 9, kind: input, shape index: {}]   ;;  %s3541_s10 = inlined_call_operand.vmem [shape: f32[8,8,128], index: 10, kind: output, shape index: {}]  }
   0x1   :  { %v2749_v0 = vld [vmem:[%s3531_s1 + $0x8] sm:$0xff]   ;;  %v2750_v1 = vld [vmem:[%s3531_s1] sm:$0xff]   ;;  %v2753_v4 = vld [vmem:[%s3532_s0 + $0x10] sm:$0xff]   ;;  %257 = vmatprep.mubr.bf16.mxu1 %v2907_v13  ;;  %v183_v53 = vlaneseq }
   0x2   :  { %2476 = vmatprep.subr.bf16.mxu0 %v2749_v0  ;;  %v2751_v2 = vld [vmem:[%s3532_s0] sm:$0xff]   ;;  %v2752_v3 = vld [vmem:[%s3532_s0 + $0x8] sm:$0xff]   ;;  %v2754_v5 = vld [vmem:[%s3532_s0 + $0x18] sm:$0xff]  }
   0x3   :  { %2477 = vmatpush3.bf16.msra.mxu0 %v2749_v0  ;;  %2480 = vmatprep.mubr.msk.bf16.mxu0 %vm87_vm0, %v2751_v2  ;;  %v2755_v6 = vld [vmem:[%s3533_s3 + $0x14] ss:$8 sps:$4 sm:$0xff]   ;;  %v2757_v7 = vld [vmem:[%s3533_s3 + $0x10] ss:$8 sps:$4 sm:$0xff]   ;;  %v2997_v8 = vld [vmem:[%s3534_s5 + $0x8] sm:$0xff]   ;;  %v184_v54 = vshrl.u32 %v183_v53, 7 }
   0x4   :  { %2478 = vmatprep.subr.bf16.mxu0 %v2750_v1  ;;  %237 = vmatprep.subr.bf16.mxu1 %v2755_v6  ;;  %v2759_v10 = vld [vmem:[%s3533_s3 + $0x4] ss:$8 sps:$4 sm:$0xff]   ;;  %v2761_v11 = vld [vmem:[%s3533_s3] ss:$8 sps:$4 sm:$0xff]  }
   0x5   :  { %238 = vmatpush1.bf16.msra.mxu1 %v2757_v7  ;;  %v3011_v12 = vld [vmem:[%s3534_s5] sm:$0xff]   ;;  %v3023_v14 = vld [vmem:[%s3535_s6 + $0x8] sm:$0xff]   ;;  %v185_v55 = vsub.s32 0, %v184_v54  ;;  %v189_v57 = vsub.s32 1, %v184_v54 }
   0x6   :  { %239 = vmatprep.subr.bf16.mxu1 %v2759_v10  ;;  %v3029_v15 = vld [vmem:[%s3535_s6] sm:$0xff]  }
   0x7   :  { %2479 = vmatpush3.bf16.msra.mxu0 %v2750_v1  ;;  %v2293_v18 = vld [vmem:[%s3536_s2] ss:$0 sm:$0xff] }
   0x8   :  { %2488 = vmatprep.subr.bf16.mxu0 %v2906_v9  ;;  %v181_v56 = vld [vmem:[%s3537_s4] sm:$0x3]  ;;  %s2909_s4 = smov 64  }
   0x9   :  { %240 = vmatpush1.bf16.msra.mxu1 %v2761_v11  ;;  %v186_v58 = vrot.slane %v181_v56, %v185_v55  ;;  %v190_v59 = vrot.slane %v181_v56, %v189_v57  ;;  %v3090_v56 = vld [vmem:[%s3538_s7 + $0x8] sm:$0xff]   ;;  %v3095_v57 = vld [vmem:[%s3538_s7] sm:$0xff]  }
   0xa   :  { %2481 = vmatmul.mubr.msk.bf16.vlgmr.msra.gmra.mxu0 %vm87_vm0, %v2752_v3  ;;  %2512 = vmatprep.subr.bf16.mxu1 %v2906_v9 }
   0xb   :  { %2484 = vmatprep.mubr.msk.bf16.mxu0 %vm87_vm0, %v2753_v4  ;;  %2489 = vmatpush3.bf16.msra.mxu0 %v2997_v8 }
   0xc   :  { %2490 = vmatprep.subr.bf16.mxu0 %v2906_v9 }
   0xf   :  { %2491 = vmatpush3.bf16.msra.mxu0 %v3011_v12 }
  0x10   :  { %2496 = vmatprep.subr.bf16.mxu0 %v2906_v9 }
  0x12   :  { %2485 = vmatmul.mubr.msk.bf16.gmra.mxu0 %vm87_vm0, %v2754_v5 }
  0x13   :  { %2492 = vmatprep.mubr.msk.bf16.mxu0 %vm2908_vm1, %v2906_v9 }
  0x1a   :  { %2493 = vmatmul.mubr.bf16.vlgmr.msra.gmra.mxu0 %v2907_v13 }
  0x1b   :  { %2500 = vmatprep.mubr.msk.bf16.mxu0 %vm2908_vm1, %v2906_v9  ;;  %2497 = vmatpush3.bf16.msra.mxu0 %v3023_v14 }
  0x1c   :  { %2498 = vmatprep.subr.bf16.mxu0 %v2906_v9 }
  0x1f   :  { %2499 = vmatpush3.bf16.msra.mxu0 %v3029_v15 }
  0x20   :  { %2504 = vmatprep.subr.bf16.mxu0 %v2906_v9 }
  0x22   :  { %2501 = vmatmul.mubr.bf16.vlgmr.msra.gmra.mxu0 %v2907_v13 }
  0x23   :  { %2508 = vmatprep.mubr.msk.bf16.mxu0 %vm2908_vm1, %v2906_v9  ;;  %2505 = vmatpush3.bf16.msra.mxu0 %v3090_v56 }
  0x24   :  { %2506 = vmatprep.subr.bf16.mxu0 %v2906_v9 }
  0x27   :  { %2507 = vmatpush3.bf16.msra.mxu0 %v3095_v57 }
  0x28   :  { %2520 = vmatprep.subr.bf16.mxu0 %v2906_v9 }
  0xca   :  { %v2482_v16 = vpop.f32.mrf.mxu0 }
  0xcb   :  { %v143_v30 = vadd.f32 %v2482_v16, %v2293_v18 }
  0xcc   :  { %v134_v17 = vpop.f32.mrf.mxu0 }
  0xcd   :  { %v135_v20 = vadd.f32 %v2293_v18, %v134_v17  ;;  %v167_v33 = vmax.f32 %v143_v30, 0.0 }
  0xce   :  { %v2483_v19 = vpop.f32.mrf.mxu0 }
  0xcf   :  { %v165_v24 = vmax.f32 %v135_v20, 0.0  ;;  %v146_v27 = vadd.f32 %v2483_v19, %v2293_v18 }
  0xd0   :  { %v137_v21 = vpop.f32.mrf.mxu0 }
  0xd1   :  { %v138_v22 = vadd.f32 %v2293_v18, %v137_v21  ;;  %v168_v31 = vmax.f32 %v146_v27, 0.0 }
  0xd2   :  { %v2486_v23 = vpop.f32.mrf.mxu0 }
  0xd3   :  { %v166_v25 = vmax.f32 %v138_v22, 0.0  ;;  %v174_v34 = vpack.c.bf16 %v168_v31, %v167_v33  ;;  %v159_v39 = vadd.f32 %v2486_v23, %v2293_v18 }
  0xd4   :  { %v150_v26 = vpop.f32.mrf.mxu0 }
  0xd5   :  { %v173_v28 = vpack.c.bf16 %v166_v25, %v165_v24  ;;  %v151_v35 = vadd.f32 %v2293_v18, %v150_v26  ;;  %v171_v42 = vmax.f32 %v159_v39, 0.0 }
  0xd6   :  { %v2487_v29 = vpop.f32.mrf.mxu0 }
  0xd7   :  { %2308 = vmatmul.mubr.msk.bf16.vlgmr.msra.gmra.mxu1 %vm87_vm0, %v173_v28  ;;  %v169_v37 = vmax.f32 %v151_v35, 0.0  ;;  %v162_v40 = vadd.f32 %v2487_v29, %v2293_v18 }
  0xd8   :  { %267 = vmatprep.mubr.bf16.mxu1 %v2907_v13  ;;  %v153_v32 = vpop.f32.mrf.mxu0 }
  0xd9   :  { %v154_v36 = vadd.f32 %v2293_v18, %v153_v32  ;;  %v172_v43 = vmax.f32 %v162_v40, 0.0 }
  0xda   :  { %v388_v45 = vpop.f32.mrf.mxu0 }
  0xdb   :  { %v170_v38 = vmax.f32 %v154_v36, 0.0  ;;  %v176_v44 = vpack.c.bf16 %v172_v43, %v171_v42 }
  0xdc   :  { %v2494_v46 = vpop.f32.mrf.mxu0 }
  0xdd   :  { %v175_v41 = vpack.c.bf16 %v170_v38, %v169_v37 }
  0xde   :  { %v391_v47 = vpop.f32.mrf.mxu0 }
  0xdf   :  { %2309 = vmatmul.mubr.msk.bf16.gmra.mxu1 %vm87_vm0, %v174_v34 }
  0xe0   :  { %277 = vmatprep.mubr.bf16.mxu1 %v2907_v13  ;;  %v2495_v48 = vpop.f32.mrf.mxu0 }
  0xe2   :  { %v465_v49 = vpop.f32.mrf.mxu0 }
  0xe4   :  { %v2502_v50 = vpop.f32.mrf.mxu0 }
  0xe6   :  { %v468_v51 = vpop.f32.mrf.mxu0 }
  0xe7   :  { %2310 = vmatmul.mubr.msk.bf16.gmra.mxu1 %vm87_vm0, %v175_v41 }
  0xe8   :  { %287 = vmatprep.mubr.bf16.mxu1 %v2907_v13  ;;  %v2503_v52 = vpop.f32.mrf.mxu0 }
  0xef   :  { %2311 = vmatmul.mubr.msk.bf16.gmra.mxu1 %vm87_vm0, %v176_v44 }
  0xf0   :  { %2516 = vmatprep.mubr.msk.bf16.mxu1 %vm2908_vm1, %v2906_v9 }
 0x197   :  { %v259_v60 = vpop.f32.mrf.mxu1 }
 0x198   :  { %v260_v61 = vadd.f32 %v259_v60, %v186_v58 }
 0x199   :  { %v261_v62 = vpop.f32.mrf.mxu1 }
 0x19a   :  { %v3048_v63 = vadd.f32 %v261_v62, %v190_v59  ;;  %v394_v0 = vadd.f32 %v388_v45, %v260_v61  ;;  %v3112_v61 = vld [vmem:[%s3539_s8] sm:$0xff]  }
 0x19b   :  { %v263_v1 = vpop.f32.mrf.mxu1 }
 0x19c   :  { %2769 = vtanh.f32 %v394_v0  ;;  %v3050_v2 = vadd.f32 %v263_v1, %v186_v58  ;;  %v2314_v37 = vmul.f32 -1.442695, %v394_v0 }
 0x19d   :  { %v265_v3 = vpop.f32.mrf.mxu1 }
 0x19e   :  { %v3052_v4 = vadd.f32 %v265_v3, %v190_v59 }
 0x19f   :  { %v269_v5 = vpop.f32.mrf.mxu1 }
 0x1a0   :  { %v3054_v6 = vadd.f32 %v269_v5, %v186_v58 }
 0x1a1   :  { %v271_v7 = vpop.f32.mrf.mxu1 }
 0x1a2   :  { %v3056_v10 = vadd.f32 %v271_v7, %v190_v59 }
 0x1a3   :  { %v273_v11 = vpop.f32.mrf.mxu1 }
 0x1a4   :  { %v3058_v13 = vadd.f32 %v273_v11, %v186_v58 }
 0x1a5   :  { %v275_v16 = vpop.f32.mrf.mxu1 }
 0x1a6   :  { %v3060_v17 = vadd.f32 %v275_v16, %v190_v59  ;;  %v3149_v16 = vld [vmem:[%s3540_s9] ss:$0 sm:$0xff] }
 0x1a7   :  { %v279_v18 = vpop.f32.mrf.mxu1 }
 0x1a8   :  { %v3062_v19 = vadd.f32 %v279_v18, %v186_v58 }
 0x1a9   :  { %v2770_v20 = vpop.eup %2769  ;;  %v281_v21 = vpop.f32.mrf.mxu1 }
 0x1aa   :  { %v3064_v22 = vadd.f32 %v281_v21, %v190_v59  ;;  %404 = vrot.lane.b32.xlu0 %v2770_v20, %s2909_s4 }
 0x1ab   :  { %v283_v23 = vpop.f32.mrf.mxu1 }
 0x1ac   :  { %v3067_v24 = vadd.f32 %v283_v23, %v186_v58 }
 0x1ad   :  { %v285_v25 = vpop.f32.mrf.mxu1 }
 0x1ae   :  { %v3069_v26 = vadd.f32 %v285_v25, %v190_v59 }
 0x1af   :  { %v289_v27 = vpop.f32.mrf.mxu1 }
 0x1b0   :  { %v3071_v28 = vadd.f32 %v289_v27, %v186_v58 }
 0x1b1   :  { %v291_v29 = vpop.f32.mrf.mxu1 }
 0x1b2   :  { %v3073_v30 = vadd.f32 %v291_v29, %v190_v59 }
 0x1b3   :  { %v293_v31 = vpop.f32.mrf.mxu1 }
 0x1b4   :  { %v3075_v32 = vadd.f32 %v293_v31, %v186_v58  ;;  %v3101_v58 = vld [vmem:[%s3539_s8 + $0x8] sm:$0xff]  }
 0x1b5   :  { %v295_v33 = vpop.f32.mrf.mxu1  ;;  %2513 = vmatpush3.bf16.msra.mxu1 %v3101_v58 }
 0x1b6   :  { %v296_v34 = vadd.f32 %v295_v33, %v190_v59  ;;  %2514 = vmatprep.subr.bf16.mxu1 %v2906_v9 }
 0x1b8   :  { %v471_v35 = vadd.f32 %v465_v49, %v296_v34 }
 0x1b9   :  { %2515 = vmatpush3.bf16.msra.mxu1 %v3112_v61 }
 0x1ba   :  { %2771 = vtanh.f32 %v471_v35  ;;  %v2317_v40 = vmul.f32 -1.442695, %v471_v35  ;;  %2528 = vmatprep.subr.bf16.mxu1 %v2906_v9 }
 0x1bb   :  { %2773 = vpow2.f32 %v2314_v37 }
 0x1c7   :  { %v2772_v36 = vpop.eup %2771 }
 0x1c8   :  { %481 = vrot.lane.b32.xlu0 %v2772_v36, %s2909_s4  ;;  %v2774_v38 = vpop.eup %2773 }
 0x1c9   :  { %v398_v39 = vadd.f32 1.0, %v2774_v38 }
 0x1cb   :  { %2775 = vrcp.f32 %v398_v39 }
 0x1cc   :  { %2777 = vpow2.f32 %v2317_v40 }
 0x1d8   :  { %v2776_v41 = vpop.eup %2775 }
 0x1d9   :  { %v2778_v44 = vpop.eup %2777  ;;  %v402_v49 = vmul.f32 0.0, %v2776_v41 }
 0x1da   :  { %v475_v45 = vadd.f32 1.0, %v2778_v44 }
 0x1dc   :  { %2779 = vrcp.f32 %v475_v45 }
 0x1e9   :  { %v2780_v46 = vpop.eup %2779 }
 0x1ea   :  { %v479_v53 = vmul.f32 0.0, %v2780_v46 }
 0x21c   :  { %v405_v42 = vpop.permute.xlu0 %404 }
 0x21d   :  { %v407_v43 = vmul.f32 %v2776_v41, %v405_v42 }
 0x21f   :  { %409 = vrot.lane.b32.xlu1 %v407_v43, %s2910_s21 }
 0x23a   :  { %v482_v47 = vpop.permute.xlu0 %481 }
 0x23b   :  { %v484_v48 = vmul.f32 %v2780_v46, %v482_v47 }
 0x23d   :  { %486 = vrot.lane.b32.xlu1 %v484_v48, %s2910_s21 }
 0x291   :  { %v410_v50 = vpop.permute.xlu1 %409 }
 0x292   :  { %v3080_v51 = vadd.f32 %v410_v50, %v402_v49 }
 0x294   :  { %2781 = vtanh.f32 %v3080_v51 }
 0x2a1   :  { %v2782_v52 = vpop.eup %2781 }
 0x2a2   :  { %415 = vrot.lane.b32.xlu0 %v2782_v52, %s2909_s4 }
 0x2af   :  { %v487_v54 = vpop.permute.xlu1 %486 }
 0x2b0   :  { %v3084_v55 = vadd.f32 %v487_v54, %v479_v53 }
 0x2b2   :  { %2783 = vtanh.f32 %v3084_v55 }
 0x2bf   :  { %v2784_v59 = vpop.eup %2783 }
 0x2c0   :  { %492 = vrot.lane.b32.xlu1 %v2784_v59, %s2909_s4 }
 0x314   :  { %v416_v60 = vpop.permute.xlu0 %415 }
 0x315   :  { %v418_v62 = vmul.f32 %v2776_v41, %v416_v60 }
 0x317   :  { %v496_v0 = vpack.c.bf16 %v418_v62, %v418_v62 }
 0x319   :  { %504 = vrot.lane.b32.xlu0 %v496_v0, %s2910_s21 }
 0x332   :  { %v493_v1 = vpop.permute.xlu1 %492 }
 0x333   :  { %v495_v3 = vmul.f32 %v2780_v46, %v493_v1 }
 0x335   :  { %v562_v5 = vpack.c.bf16 %v495_v3, %v495_v3 }
 0x337   :  { %564 = vrot.lane.b32.xlu1 %v562_v5, %s2910_s21 }
 0x38b   :  { %v505_v7 = vpop.permute.xlu0 %504 }
 0x38c   :  { %2509 = vmatmul.mubr.msk.bf16.vlgmr.msra.gmra.mxu0 %vm87_vm0, %v505_v7 }
 0x38d   :  { %2521 = vmatpush3.bf16.msra.mxu0 %v2997_v8  ;;  %2524 = vmatprep.mubr.msk.bf16.mxu0 %vm2908_vm1, %v2906_v9 }
 0x38e   :  { %2522 = vmatprep.subr.bf16.mxu0 %v2906_v9 }
 0x391   :  { %2523 = vmatpush3.bf16.msra.mxu0 %v3011_v12 }
 0x392   :  { %2536 = vmatprep.subr.bf16.mxu0 %v2906_v9 }
 0x394   :  { %2525 = vmatmul.mubr.msk.bf16.vlgmr.msra.gmra.mxu0 %vm87_vm0, %v505_v7 }
 0x395   :  { %2537 = vmatpush3.bf16.msra.mxu0 %v3090_v56  ;;  %2540 = vmatprep.mubr.msk.bf16.mxu0 %vm2908_vm1, %v2906_v9 }
 0x396   :  { %2538 = vmatprep.subr.bf16.mxu0 %v2906_v9 }
 0x399   :  { %2539 = vmatpush3.bf16.msra.mxu0 %v3095_v57 }
 0x39a   :  { %2552 = vmatprep.subr.bf16.mxu0 %v2906_v9 }
 0x3a9   :  { %v565_v11 = vpop.permute.xlu1 %564 }
 0x3aa   :  { %2517 = vmatmul.mubr.msk.bf16.vlgmr.msra.gmra.mxu1 %vm87_vm0, %v565_v11 }
 0x3ab   :  { %2529 = vmatpush3.bf16.msra.mxu1 %v3023_v14  ;;  %2532 = vmatprep.mubr.msk.bf16.mxu1 %vm2908_vm1, %v2906_v9 }
 0x3ac   :  { %2530 = vmatprep.subr.bf16.mxu1 %v2906_v9 }
 0x3af   :  { %2531 = vmatpush3.bf16.msra.mxu1 %v3029_v15 }
 0x3b0   :  { %2544 = vmatprep.subr.bf16.mxu1 %v2906_v9 }
 0x3b2   :  { %2533 = vmatmul.mubr.msk.bf16.vlgmr.msra.gmra.mxu1 %vm87_vm0, %v565_v11 }
 0x3b3   :  { %2545 = vmatpush3.bf16.msra.mxu1 %v3101_v58  ;;  %2548 = vmatprep.mubr.msk.bf16.mxu1 %vm2908_vm1, %v2906_v9 }
 0x3b4   :  { %2546 = vmatprep.subr.bf16.mxu1 %v2906_v9 }
 0x3b7   :  { %2547 = vmatpush3.bf16.msra.mxu1 %v3112_v61 }
 0x3b8   :  { %2560 = vmatprep.subr.bf16.mxu1 %v2906_v9 }
 0x44c   :  { %v555_v18 = vpop.f32.mrf.mxu0 }
 0x44d   :  { %v556_v20 = vadd.f32 %v3149_v16, %v555_v18 }
 0x44e   :  { %v2510_v21 = vpop.f32.mrf.mxu0 }
 0x44f   :  { %561 = vst [vmem:[%s3541_s10] sm:$0xff] %v556_v20 }
 0x450   :  { %v558_v23 = vpop.f32.mrf.mxu0 }
 0x452   :  { %v2511_v25 = vpop.f32.mrf.mxu0 }
 0x454   :  { %v665_v27 = vpop.f32.mrf.mxu0 }
 0x455   :  { %v671_v29 = vadd.f32 %v665_v27, %v3050_v2 }
 0x456   :  { %v2526_v31 = vpop.f32.mrf.mxu0 }
 0x457   :  { %2785 = vtanh.f32 %v671_v29  ;;  %v2326_v45 = vmul.f32 -1.442695, %v671_v29 }
 0x458   :  { %v668_v33 = vpop.f32.mrf.mxu0 }
 0x45a   :  { %v2527_v34 = vpop.f32.mrf.mxu0 }
 0x464   :  { %v2786_v35 = vpop.eup %2785 }
 0x465   :  { %681 = vrot.lane.b32.xlu0 %v2786_v35, %s2909_s4 }
 0x46a   :  { %v3157_v36 = vpop.f32.mrf.mxu1 }
 0x46c   :  { %v2518_v37 = vpop.f32.mrf.mxu1 }
 0x46e   :  { %v618_v38 = vpop.f32.mrf.mxu1 }
 0x470   :  { %v2519_v39 = vpop.f32.mrf.mxu1 }
 0x472   :  { %v730_v40 = vpop.f32.mrf.mxu1 }
 0x473   :  { %v736_v41 = vadd.f32 %v730_v40, %v3073_v30 }
 0x474   :  { %v2534_v42 = vpop.f32.mrf.mxu1 }
 0x475   :  { %2787 = vtanh.f32 %v736_v41  ;;  %v2328_v48 = vmul.f32 -1.442695, %v736_v41 }
 0x476   :  { %v733_v43 = vpop.f32.mrf.mxu1  ;;  %2789 = vpow2.f32 %v2326_v45 }
 0x478   :  { %v2535_v44 = vpop.f32.mrf.mxu1 }
 0x482   :  { %v2788_v2 = vpop.eup %2787 }
 0x483   :  { %746 = vrot.lane.b32.xlu1 %v2788_v2, %s2909_s4  ;;  %v2790_v46 = vpop.eup %2789 }
 0x484   :  { %v675_v47 = vadd.f32 1.0, %v2790_v46 }
 0x486   :  { %2791 = vrcp.f32 %v675_v47 }
 0x487   :  { %2793 = vpow2.f32 %v2328_v48 }
 0x493   :  { %v2792_v49 = vpop.eup %2791 }
 0x494   :  { %v2794_v30 = vpop.eup %2793  ;;  %v679_v62 = vmul.f32 %v2792_v49, %v3080_v51 }
 0x495   :  { %v740_v53 = vadd.f32 1.0, %v2794_v30 }
 0x497   :  { %2795 = vrcp.f32 %v740_v53 }
 0x4a4   :  { %v2796_v54 = vpop.eup %2795 }
 0x4a5   :  { %v744_v5 = vmul.f32 %v2796_v54, %v3084_v55 }
 0x4d7   :  { %v682_v50 = vpop.permute.xlu0 %681 }
 0x4d8   :  { %v684_v52 = vmul.f32 %v2792_v49, %v682_v50 }
 0x4da   :  { %686 = vrot.lane.b32.xlu0 %v684_v52, %s2910_s21 }
 0x4f5   :  { %v747_v59 = vpop.permute.xlu1 %746 }
 0x4f6   :  { %v749_v60 = vmul.f32 %v2796_v54, %v747_v59 }
 0x4f8   :  { %751 = vrot.lane.b32.xlu1 %v749_v60, %s2910_s21 }
 0x54c   :  { %v687_v0 = vpop.permute.xlu0 %686 }
 0x54d   :  { %v3164_v1 = vadd.f32 %v687_v0, %v679_v62 }
 0x54f   :  { %2797 = vtanh.f32 %v3164_v1 }
 0x55c   :  { %v2798_v3 = vpop.eup %2797 }
 0x55d   :  { %692 = vrot.lane.b32.xlu0 %v2798_v3, %s2909_s4 }
 0x56a   :  { %v752_v7 = vpop.permute.xlu1 %751 }
 0x56b   :  { %v3169_v11 = vadd.f32 %v752_v7, %v744_v5 }
 0x56d   :  { %2799 = vtanh.f32 %v3169_v11 }
 0x57a   :  { %v2800_v18 = vpop.eup %2799 }
 0x57b   :  { %757 = vrot.lane.b32.xlu1 %v2800_v18, %s2909_s4 }
 0x5cf   :  { %v693_v20 = vpop.permute.xlu0 %692 }
 0x5d0   :  { %v695_v51 = vmul.f32 %v2792_v49, %v693_v20 }
 0x5d2   :  { %v761_v21 = vpack.c.bf16 %v695_v51, %v695_v51 }
 0x5d4   :  { %763 = vrot.lane.b32.xlu0 %v761_v21, %s2910_s21 }
 0x5ed   :  { %v758_v23 = vpop.permute.xlu1 %757 }
 0x5ee   :  { %v760_v25 = vmul.f32 %v2796_v54, %v758_v23 }
 0x5f0   :  { %v810_v27 = vpack.c.bf16 %v760_v25, %v760_v25 }
 0x5f2   :  { %812 = vrot.lane.b32.xlu1 %v810_v27, %s2910_s21 }
 0x646   :  { %v764_v29 = vpop.permute.xlu0 %763 }
 0x647   :  { %2541 = vmatmul.mubr.msk.bf16.vlgmr.msra.gmra.mxu0 %vm87_vm0, %v764_v29 }
 0x648   :  { %2553 = vmatpush3.bf16.msra.mxu0 %v2997_v8  ;;  %2556 = vmatprep.mubr.msk.bf16.mxu0 %vm2908_vm1, %v2906_v9 }
 0x649   :  { %2554 = vmatprep.subr.bf16.mxu0 %v2906_v9 }
 0x64c   :  { %2555 = vmatpush3.bf16.msra.mxu0 %v3011_v12 }
 0x64d   :  { %2568 = vmatprep.subr.bf16.mxu0 %v2906_v9 }
 0x64f   :  { %2557 = vmatmul.mubr.msk.bf16.vlgmr.msra.gmra.mxu0 %vm87_vm0, %v764_v29 }
 0x650   :  { %2569 = vmatpush3.bf16.msra.mxu0 %v3090_v56  ;;  %2572 = vmatprep.mubr.msk.bf16.mxu0 %vm2908_vm1, %v2906_v9 }
 0x651   :  { %2570 = vmatprep.subr.bf16.mxu0 %v2906_v9 }
 0x654   :  { %2571 = vmatpush3.bf16.msra.mxu0 %v3095_v57 }
 0x655   :  { %2584 = vmatprep.subr.bf16.mxu0 %v2906_v9 }
 0x664   :  { %v813_v55 = vpop.permute.xlu1 %812 }
 0x665   :  { %2549 = vmatmul.mubr.msk.bf16.vlgmr.msra.gmra.mxu1 %vm87_vm0, %v813_v55 }
 0x666   :  { %2561 = vmatpush3.bf16.msra.mxu1 %v3023_v14  ;;  %2564 = vmatprep.mubr.msk.bf16.mxu1 %vm2908_vm1, %v2906_v9 }
 0x667   :  { %2562 = vmatprep.subr.bf16.mxu1 %v2906_v9 }
 0x66a   :  { %2563 = vmatpush3.bf16.msra.mxu1 %v3029_v15 }
 0x66b   :  { %2576 = vmatprep.subr.bf16.mxu1 %v2906_v9 }
 0x66d   :  { %2565 = vmatmul.mubr.msk.bf16.vlgmr.msra.gmra.mxu1 %vm87_vm0, %v813_v55 }
 0x66e   :  { %2577 = vmatpush3.bf16.msra.mxu1 %v3101_v58  ;;  %2580 = vmatprep.mubr.msk.bf16.mxu1 %vm2908_vm1, %v2906_v9 }
 0x66f   :  { %2578 = vmatprep.subr.bf16.mxu1 %v2906_v9 }
 0x672   :  { %2579 = vmatpush3.bf16.msra.mxu1 %v3112_v61 }
 0x673   :  { %2592 = vmatprep.subr.bf16.mxu1 %v2906_v9 }
 0x707   :  { %v3203_v31 = vpop.f32.mrf.mxu0 }
 0x709   :  { %v2542_v33 = vpop.f32.mrf.mxu0 }
 0x70b   :  { %v805_v34 = vpop.f32.mrf.mxu0 }
 0x70d   :  { %v2543_v35 = vpop.f32.mrf.mxu0 }
 0x70f   :  { %v901_v37 = vpop.f32.mrf.mxu0 }
 0x710   :  { %v907_v38 = vadd.f32 %v901_v37, %v3054_v6 }
 0x711   :  { %v2558_v39 = vpop.f32.mrf.mxu0 }
 0x712   :  { %2801 = vtanh.f32 %v907_v38  ;;  %v2333_v52 = vmul.f32 -1.442695, %v907_v38 }
 0x713   :  { %v904_v40 = vpop.f32.mrf.mxu0 }
 0x715   :  { %v2559_v41 = vpop.f32.mrf.mxu0 }
 0x71f   :  { %v2802_v42 = vpop.eup %2801 }
 0x720   :  { %917 = vrot.lane.b32.xlu0 %v2802_v42, %s2909_s4 }
 0x725   :  { %v3207_v43 = vpop.f32.mrf.mxu1 }
 0x727   :  { %v2550_v44 = vpop.f32.mrf.mxu1 }
 0x729   :  { %v854_v2 = vpop.f32.mrf.mxu1 }
 0x72b   :  { %v2551_v45 = vpop.f32.mrf.mxu1 }
 0x72d   :  { %v966_v46 = vpop.f32.mrf.mxu1 }
 0x72e   :  { %v972_v47 = vadd.f32 %v966_v46, %v3069_v26 }
 0x72f   :  { %v2566_v48 = vpop.f32.mrf.mxu1 }
 0x730   :  { %2803 = vtanh.f32 %v972_v47  ;;  %v2335_v54 = vmul.f32 -1.442695, %v972_v47 }
 0x731   :  { %v969_v49 = vpop.f32.mrf.mxu1  ;;  %2805 = vpow2.f32 %v2333_v52 }
 0x733   :  { %v2567_v50 = vpop.f32.mrf.mxu1 }
 0x73d   :  { %v2804_v6 = vpop.eup %2803 }
 0x73e   :  { %982 = vrot.lane.b32.xlu1 %v2804_v6, %s2909_s4  ;;  %v2806_v30 = vpop.eup %2805 }
 0x73f   :  { %v911_v53 = vadd.f32 1.0, %v2806_v30 }
 0x741   :  { %2807 = vrcp.f32 %v911_v53 }
 0x742   :  { %2809 = vpow2.f32 %v2335_v54 }
 0x74e   :  { %v2808_v59 = vpop.eup %2807 }
 0x74f   :  { %v2810_v26 = vpop.eup %2809  ;;  %v915_v18 = vmul.f32 %v2808_v59, %v3164_v1 }
 0x750   :  { %v976_v0 = vadd.f32 1.0, %v2810_v26 }
 0x752   :  { %2811 = vrcp.f32 %v976_v0 }
 0x75f   :  { %v2812_v3 = vpop.eup %2811 }
 0x760   :  { %v980_v23 = vmul.f32 %v2812_v3, %v3169_v11 }
 0x792   :  { %v918_v60 = vpop.permute.xlu0 %917 }
 0x793   :  { %v920_v62 = vmul.f32 %v2808_v59, %v918_v60 }
 0x795   :  { %922 = vrot.lane.b32.xlu0 %v920_v62, %s2910_s21 }
 0x7b0   :  { %v983_v5 = vpop.permute.xlu1 %982 }
 0x7b1   :  { %v985_v7 = vmul.f32 %v2812_v3, %v983_v5 }
 0x7b3   :  { %987 = vrot.lane.b32.xlu1 %v985_v7, %s2910_s21 }
 0x807   :  { %v923_v20 = vpop.permute.xlu0 %922 }
 0x808   :  { %v3214_v51 = vadd.f32 %v923_v20, %v915_v18 }
 0x80a   :  { %2813 = vtanh.f32 %v3214_v51 }
 0x817   :  { %v2814_v21 = vpop.eup %2813 }
 0x818   :  { %928 = vrot.lane.b32.xlu0 %v2814_v21, %s2909_s4 }
 0x825   :  { %v988_v25 = vpop.permute.xlu1 %987 }
 0x826   :  { %v3219_v27 = vadd.f32 %v988_v25, %v980_v23 }
 0x828   :  { %2815 = vtanh.f32 %v3219_v27 }
 0x835   :  { %v2816_v29 = vpop.eup %2815 }
 0x836   :  { %993 = vrot.lane.b32.xlu1 %v2816_v29, %s2909_s4 }
 0x88a   :  { %v929_v55 = vpop.permute.xlu0 %928 }
 0x88b   :  { %v931_v1 = vmul.f32 %v2808_v59, %v929_v55 }
 0x88d   :  { %v997_v33 = vpack.c.bf16 %v931_v1, %v931_v1 }
 0x88f   :  { %999 = vrot.lane.b32.xlu0 %v997_v33, %s2910_s21 }
 0x8a8   :  { %v994_v34 = vpop.permute.xlu1 %993 }
 0x8a9   :  { %v996_v35 = vmul.f32 %v2812_v3, %v994_v34 }
 0x8ab   :  { %v1046_v37 = vpack.c.bf16 %v996_v35, %v996_v35 }
 0x8ad   :  { %1048 = vrot.lane.b32.xlu1 %v1046_v37, %s2910_s21 }
 0x901   :  { %v1000_v38 = vpop.permute.xlu0 %999 }
 0x902   :  { %2573 = vmatmul.mubr.msk.bf16.vlgmr.msra.gmra.mxu0 %vm87_vm0, %v1000_v38 }
 0x903   :  { %2585 = vmatpush3.bf16.msra.mxu0 %v2997_v8  ;;  %2588 = vmatprep.mubr.msk.bf16.mxu0 %vm2908_vm1, %v2906_v9 }
 0x904   :  { %2586 = vmatprep.subr.bf16.mxu0 %v2906_v9 }
 0x907   :  { %2587 = vmatpush3.bf16.msra.mxu0 %v3011_v12 }
 0x908   :  { %2600 = vmatprep.subr.bf16.mxu0 %v2906_v9 }
 0x90a   :  { %2589 = vmatmul.mubr.msk.bf16.vlgmr.msra.gmra.mxu0 %vm87_vm0, %v1000_v38 }
 0x90b   :  { %2601 = vmatpush3.bf16.msra.mxu0 %v3090_v56  ;;  %2604 = vmatprep.mubr.msk.bf16.mxu0 %vm2908_vm1, %v2906_v9 }
 0x90c   :  { %2602 = vmatprep.subr.bf16.mxu0 %v2906_v9 }
 0x90f   :  { %2603 = vmatpush3.bf16.msra.mxu0 %v3095_v57 }
 0x910   :  { %2616 = vmatprep.subr.bf16.mxu0 %v2906_v9 }
 0x91f   :  { %v1049_v11 = vpop.permute.xlu1 %1048 }
 0x920   :  { %2581 = vmatmul.mubr.msk.bf16.vlgmr.msra.gmra.mxu1 %vm87_vm0, %v1049_v11 }
 0x921   :  { %2593 = vmatpush3.bf16.msra.mxu1 %v3023_v14  ;;  %2596 = vmatprep.mubr.msk.bf16.mxu1 %vm2908_vm1, %v2906_v9 }
 0x922   :  { %2594 = vmatprep.subr.bf16.mxu1 %v2906_v9 }
 0x925   :  { %2595 = vmatpush3.bf16.msra.mxu1 %v3029_v15 }
 0x926   :  { %2608 = vmatprep.subr.bf16.mxu1 %v2906_v9 }
 0x928   :  { %2597 = vmatmul.mubr.msk.bf16.vlgmr.msra.gmra.mxu1 %vm87_vm0, %v1049_v11 }
 0x929   :  { %2609 = vmatpush3.bf16.msra.mxu1 %v3101_v58  ;;  %2612 = vmatprep.mubr.msk.bf16.mxu1 %vm2908_vm1, %v2906_v9 }
 0x92a   :  { %2610 = vmatprep.subr.bf16.mxu1 %v2906_v9 }
 0x92d   :  { %2611 = vmatpush3.bf16.msra.mxu1 %v3112_v61 }
 0x92e   :  { %2624 = vmatprep.subr.bf16.mxu1 %v2906_v9 }
 0x9c2   :  { %v3253_v39 = vpop.f32.mrf.mxu0 }
 0x9c4   :  { %v2574_v40 = vpop.f32.mrf.mxu0 }
 0x9c6   :  { %v1041_v41 = vpop.f32.mrf.mxu0 }
 0x9c8   :  { %v2575_v42 = vpop.f32.mrf.mxu0 }
 0x9ca   :  { %v1137_v44 = vpop.f32.mrf.mxu0 }
 0x9cb   :  { %v1143_v2 = vadd.f32 %v1137_v44, %v3058_v13 }
 0x9cc   :  { %v2590_v45 = vpop.f32.mrf.mxu0 }
 0x9cd   :  { %2817 = vtanh.f32 %v1143_v2  ;;  %v2340_v62 = vmul.f32 -1.442695, %v1143_v2 }
 0x9ce   :  { %v1140_v46 = vpop.f32.mrf.mxu0 }
 0x9d0   :  { %v2591_v47 = vpop.f32.mrf.mxu0 }
 0x9da   :  { %v2818_v48 = vpop.eup %2817 }
 0x9db   :  { %1153 = vrot.lane.b32.xlu0 %v2818_v48, %s2909_s4 }
 0x9e0   :  { %v3257_v49 = vpop.f32.mrf.mxu1 }
 0x9e2   :  { %v2582_v50 = vpop.f32.mrf.mxu1 }
 0x9e4   :  { %v1090_v6 = vpop.f32.mrf.mxu1 }
 0x9e6   :  { %v2583_v52 = vpop.f32.mrf.mxu1 }
 0x9e8   :  { %v1202_v30 = vpop.f32.mrf.mxu1 }
 0x9e9   :  { %v1208_v53 = vadd.f32 %v1202_v30, %v3064_v22 }
 0x9ea   :  { %v2598_v54 = vpop.f32.mrf.mxu1 }
 0x9eb   :  { %2819 = vtanh.f32 %v1208_v53  ;;  %v2342_v3 = vmul.f32 -1.442695, %v1208_v53 }
 0x9ec   :  { %v1205_v59 = vpop.f32.mrf.mxu1  ;;  %2821 = vpow2.f32 %v2340_v62 }
 0x9ee   :  { %v2599_v60 = vpop.f32.mrf.mxu1 }
 0x9f8   :  { %v2820_v13 = vpop.eup %2819 }
 0x9f9   :  { %1218 = vrot.lane.b32.xlu1 %v2820_v13, %s2909_s4  ;;  %v2822_v26 = vpop.eup %2821 }
 0x9fa   :  { %v1147_v0 = vadd.f32 1.0, %v2822_v26 }
 0x9fc   :  { %2823 = vrcp.f32 %v1147_v0 }
 0x9fd   :  { %2825 = vpow2.f32 %v2342_v3 }
 0xa09   :  { %v2824_v5 = vpop.eup %2823 }
 0xa0a   :  { %v2826_v22 = vpop.eup %2825  ;;  %v1151_v29 = vmul.f32 %v2824_v5, %v3214_v51 }
 0xa0b   :  { %v1212_v20 = vadd.f32 1.0, %v2826_v22 }
 0xa0d   :  { %2827 = vrcp.f32 %v1212_v20 }
 0xa1a   :  { %v2828_v21 = vpop.eup %2827 }
 0xa1b   :  { %v1216_v34 = vmul.f32 %v2828_v21, %v3219_v27 }
 0xa4d   :  { %v1154_v7 = vpop.permute.xlu0 %1153 }
 0xa4e   :  { %v1156_v18 = vmul.f32 %v2824_v5, %v1154_v7 }
 0xa50   :  { %1158 = vrot.lane.b32.xlu0 %v1156_v18, %s2910_s21 }
 0xa6b   :  { %v1219_v23 = vpop.permute.xlu1 %1218 }
 0xa6c   :  { %v1221_v25 = vmul.f32 %v2828_v21, %v1219_v23 }
 0xa6e   :  { %1223 = vrot.lane.b32.xlu1 %v1221_v25, %s2910_s21 }
 0xac2   :  { %v1159_v55 = vpop.permute.xlu0 %1158 }
 0xac3   :  { %v3264_v1 = vadd.f32 %v1159_v55, %v1151_v29 }
 0xac5   :  { %2829 = vtanh.f32 %v3264_v1 }
 0xad2   :  { %v2830_v33 = vpop.eup %2829 }
 0xad3   :  { %1164 = vrot.lane.b32.xlu0 %v2830_v33, %s2909_s4 }
 0xae0   :  { %v1224_v35 = vpop.permute.xlu1 %1223 }
 0xae1   :  { %v3269_v37 = vadd.f32 %v1224_v35, %v1216_v34 }
 0xae3   :  { %2831 = vtanh.f32 %v3269_v37 }
 0xaf0   :  { %v2832_v38 = vpop.eup %2831 }
 0xaf1   :  { %1229 = vrot.lane.b32.xlu1 %v2832_v38, %s2909_s4 }
 0xb45   :  { %v1165_v11 = vpop.permute.xlu0 %1164 }
 0xb46   :  { %v1167_v51 = vmul.f32 %v2824_v5, %v1165_v11 }
 0xb48   :  { %v1233_v40 = vpack.c.bf16 %v1167_v51, %v1167_v51 }
 0xb4a   :  { %1235 = vrot.lane.b32.xlu0 %v1233_v40, %s2910_s21 }
 0xb63   :  { %v1230_v41 = vpop.permute.xlu1 %1229 }
 0xb64   :  { %v1232_v42 = vmul.f32 %v2828_v21, %v1230_v41 }
 0xb66   :  { %v1282_v44 = vpack.c.bf16 %v1232_v42, %v1232_v42 }
 0xb68   :  { %1284 = vrot.lane.b32.xlu1 %v1282_v44, %s2910_s21 }
 0xbbc   :  { %v1236_v2 = vpop.permute.xlu0 %1235 }
 0xbbd   :  { %2605 = vmatmul.mubr.msk.bf16.vlgmr.msra.gmra.mxu0 %vm87_vm0, %v1236_v2 }
 0xbbe   :  { %2617 = vmatpush3.bf16.msra.mxu0 %v2997_v8  ;;  %2620 = vmatprep.mubr.msk.bf16.mxu0 %vm2908_vm1, %v2906_v9 }
 0xbbf   :  { %2618 = vmatprep.subr.bf16.mxu0 %v2906_v9 }
 0xbc2   :  { %2619 = vmatpush3.bf16.msra.mxu0 %v3011_v12 }
 0xbc3   :  { %2632 = vmatprep.subr.bf16.mxu0 %v2906_v9 }
 0xbc5   :  { %2621 = vmatmul.mubr.msk.bf16.vlgmr.msra.gmra.mxu0 %vm87_vm0, %v1236_v2 }
 0xbc6   :  { %2633 = vmatpush3.bf16.msra.mxu0 %v3090_v56  ;;  %2636 = vmatprep.mubr.msk.bf16.mxu0 %vm2908_vm1, %v2906_v9 }
 0xbc7   :  { %2634 = vmatprep.subr.bf16.mxu0 %v2906_v9 }
 0xbca   :  { %2635 = vmatpush3.bf16.msra.mxu0 %v3095_v57 }
 0xbcb   :  { %2648 = vmatprep.subr.bf16.mxu0 %v2906_v9 }
 0xbda   :  { %v1285_v8 = vpop.permute.xlu1 %1284 }
 0xbdb   :  { %2613 = vmatmul.mubr.msk.bf16.vlgmr.msra.gmra.mxu1 %vm87_vm0, %v1285_v8 }
 0xbdc   :  { %2625 = vmatpush3.bf16.msra.mxu1 %v3023_v14  ;;  %2628 = vmatprep.mubr.msk.bf16.mxu1 %vm2908_vm1, %v2906_v9 }
 0xbdd   :  { %2626 = vmatprep.subr.bf16.mxu1 %v2906_v9 }
 0xbe0   :  { %2627 = vmatpush3.bf16.msra.mxu1 %v3029_v15 }
 0xbe1   :  { %2640 = vmatprep.subr.bf16.mxu1 %v2906_v9 }
 0xbe3   :  { %2629 = vmatmul.mubr.msk.bf16.vlgmr.msra.gmra.mxu1 %vm87_vm0, %v1285_v8 }
 0xbe4   :  { %2641 = vmatpush3.bf16.msra.mxu1 %v3101_v58  ;;  %2644 = vmatprep.mubr.msk.bf16.mxu1 %vm2908_vm1, %v2906_v9 }
 0xbe5   :  { %2642 = vmatprep.subr.bf16.mxu1 %v2906_v9 }
 0xbe8   :  { %2643 = vmatpush3.bf16.msra.mxu1 %v3112_v61 }
 0xbe9   :  { %2656 = vmatprep.subr.bf16.mxu1 %v2906_v9 }
 0xc7d   :  { %v3303_v12 = vpop.f32.mrf.mxu0 }
 0xc7f   :  { %v2606_v14 = vpop.f32.mrf.mxu0 }
 0xc81   :  { %v1277_v27 = vpop.f32.mrf.mxu0 }
 0xc82   :  { %v3338_v27 = vld [vmem:[%s3534_s5] sm:$0xff]  }
 0xc83   :  { %v2607_v15 = vpop.f32.mrf.mxu0 }
 0xc85   :  { %v1367_v45 = vpop.f32.mrf.mxu0 }
 0xc86   :  { %v1373_v46 = vadd.f32 %v1367_v45, %v3062_v19  ;;  %v3353_v45 = vld [vmem:[%s3535_s6 + $0x8] sm:$0xff]  }
 0xc87   :  { %v2622_v47 = vpop.f32.mrf.mxu0 }
 0xc88   :  { %2833 = vtanh.f32 %v1373_v46  ;;  %v2347_v0 = vmul.f32 -1.442695, %v1373_v46  ;;  %v3362_v46 = vld [vmem:[%s3535_s6] sm:$0xff]  }
 0xc89   :  { %v1370_v48 = vpop.f32.mrf.mxu0 }
 0xc8b   :  { %v2623_v50 = vpop.f32.mrf.mxu0 }
 0xc95   :  { %v2834_v6 = vpop.eup %2833 }
 0xc96   :  { %1383 = vrot.lane.b32.xlu0 %v2834_v6, %s2909_s4 }
 0xc9b   :  { %v3307_v52 = vpop.f32.mrf.mxu1 }
 0xc9d   :  { %v2614_v30 = vpop.f32.mrf.mxu1 }
 0xc9f   :  { %v1326_v53 = vpop.f32.mrf.mxu1 }
 0xca1   :  { %v2615_v54 = vpop.f32.mrf.mxu1 }
 0xca3   :  { %v1432_v59 = vpop.f32.mrf.mxu1 }
 0xca4   :  { %v1438_v60 = vadd.f32 %v1432_v59, %v3060_v17 }
 0xca5   :  { %v2630_v13 = vpop.f32.mrf.mxu1 }
 0xca6   :  { %2835 = vtanh.f32 %v1438_v60  ;;  %v2349_v7 = vmul.f32 -1.442695, %v1438_v60 }
 0xca7   :  { %v1435_v62 = vpop.f32.mrf.mxu1  ;;  %2837 = vpow2.f32 %v2347_v0 }
 0xca9   :  { %v2631_v26 = vpop.f32.mrf.mxu1 }
 0xcb3   :  { %v2836_v19 = vpop.eup %2835 }
 0xcb4   :  { %1448 = vrot.lane.b32.xlu1 %v2836_v19, %s2909_s4  ;;  %v2838_v3 = vpop.eup %2837  ;;  %v1275_v19 = vadd.f32 %v3149_v16, %v3303_v12 }
 0xcb5   :  { %v1377_v5 = vadd.f32 1.0, %v2838_v3 }
 0xcb7   :  { %2839 = vrcp.f32 %v1377_v5 }
 0xcb8   :  { %2841 = vpow2.f32 %v2349_v7 }
 0xcc4   :  { %v2840_v18 = vpop.eup %2839 }
 0xcc5   :  { %v2842_v17 = vpop.eup %2841  ;;  %v1381_v55 = vmul.f32 %v2840_v18, %v3264_v1 }
 0xcc6   :  { %v1442_v21 = vadd.f32 1.0, %v2842_v17 }
 0xcc8   :  { %2843 = vrcp.f32 %v1442_v21 }
 0xcd5   :  { %v2844_v23 = vpop.eup %2843 }
 0xcd6   :  { %v1446_v38 = vmul.f32 %v2844_v23, %v3269_v37  ;;  %v3329_v37 = vld [vmem:[%s3534_s5 + $0x8] sm:$0xff]  }
 0xd08   :  { %v1384_v22 = vpop.permute.xlu0 %1383 }
 0xd09   :  { %v1386_v20 = vmul.f32 %v2840_v18, %v1384_v22 }
 0xd0b   :  { %1388 = vrot.lane.b32.xlu0 %v1386_v20, %s2910_s21 }
 0xd26   :  { %v1449_v25 = vpop.permute.xlu1 %1448 }
 0xd27   :  { %v1451_v29 = vmul.f32 %v2844_v23, %v1449_v25 }
 0xd29   :  { %1453 = vrot.lane.b32.xlu1 %v1451_v29, %s2910_s21 }
 0xd7d   :  { %v1389_v33 = vpop.permute.xlu0 %1388 }
 0xd7e   :  { %v3314_v34 = vadd.f32 %v1389_v33, %v1381_v55 }
 0xd80   :  { %2845 = vtanh.f32 %v3314_v34 }
 0xd8d   :  { %v2846_v35 = vpop.eup %2845 }
 0xd8e   :  { %1394 = vrot.lane.b32.xlu0 %v2846_v35, %s2909_s4 }
 0xd9b   :  { %v1454_v11 = vpop.permute.xlu1 %1453 }
 0xd9c   :  { %v3319_v51 = vadd.f32 %v1454_v11, %v1446_v38 }
 0xd9e   :  { %2847 = vtanh.f32 %v3319_v51 }
 0xdab   :  { %v2848_v40 = vpop.eup %2847 }
 0xdac   :  { %1459 = vrot.lane.b32.xlu1 %v2848_v40, %s2909_s4 }
 0xe00   :  { %v1395_v41 = vpop.permute.xlu0 %1394 }
 0xe01   :  { %v1397_v1 = vmul.f32 %v2840_v18, %v1395_v41 }
 0xe03   :  { %v1463_v42 = vpack.c.bf16 %v1397_v1, %v1397_v1 }
 0xe05   :  { %1465 = vrot.lane.b32.xlu0 %v1463_v42, %s2910_s21 }
 0xe1e   :  { %v1460_v44 = vpop.permute.xlu1 %1459 }
 0xe1f   :  { %v1462_v2 = vmul.f32 %v2844_v23, %v1460_v44 }
 0xe21   :  { %v1512_v8 = vpack.c.bf16 %v1462_v2, %v1462_v2 }
 0xe23   :  { %1514 = vrot.lane.b32.xlu1 %v1512_v8, %s2910_s21 }
 0xe77   :  { %v1466_v14 = vpop.permute.xlu0 %1465 }
 0xe78   :  { %2637 = vmatmul.mubr.msk.bf16.vlgmr.msra.gmra.mxu0 %vm87_vm0, %v1466_v14 }
 0xe79   :  { %2649 = vmatpush3.bf16.msra.mxu0 %v3329_v37  ;;  %2652 = vmatprep.mubr.msk.bf16.mxu0 %vm2908_vm1, %v2906_v9 }
 0xe7a   :  { %2650 = vmatprep.subr.bf16.mxu0 %v2906_v9 }
 0xe7d   :  { %2651 = vmatpush3.bf16.msra.mxu0 %v3338_v27 }
 0xe7e   :  { %2664 = vmatprep.subr.bf16.mxu0 %v2906_v9 }
 0xe80   :  { %2653 = vmatmul.mubr.msk.bf16.vlgmr.msra.gmra.mxu0 %vm87_vm0, %v1466_v14 }
 0xe81   :  { %2665 = vmatpush3.bf16.msra.mxu0 %v3090_v56  ;;  %2668 = vmatprep.mubr.msk.bf16.mxu0 %vm2908_vm1, %v2906_v9 }
 0xe82   :  { %2666 = vmatprep.subr.bf16.mxu0 %v2906_v9 }
 0xe85   :  { %2667 = vmatpush3.bf16.msra.mxu0 %v3095_v57 }
 0xe86   :  { %2680 = vmatprep.subr.bf16.mxu0 %v2906_v9 }
 0xe95   :  { %v1515_v15 = vpop.permute.xlu1 %1514 }
 0xe96   :  { %2645 = vmatmul.mubr.msk.bf16.vlgmr.msra.gmra.mxu1 %vm87_vm0, %v1515_v15 }
 0xe97   :  { %2657 = vmatpush3.bf16.msra.mxu1 %v3353_v45  ;;  %2660 = vmatprep.mubr.msk.bf16.mxu1 %vm2908_vm1, %v2906_v9 }
 0xe98   :  { %2658 = vmatprep.subr.bf16.mxu1 %v2906_v9 }
 0xe9b   :  { %2659 = vmatpush3.bf16.msra.mxu1 %v3362_v46 }
 0xe9c   :  { %2672 = vmatprep.subr.bf16.mxu1 %v2906_v9 }
 0xe9e   :  { %2661 = vmatmul.mubr.msk.bf16.vlgmr.msra.gmra.mxu1 %vm87_vm0, %v1515_v15 }
 0xe9f   :  { %2673 = vmatpush3.bf16.msra.mxu1 %v3101_v58  ;;  %2676 = vmatprep.mubr.msk.bf16.mxu1 %vm2908_vm1, %v2906_v9 }
 0xea0   :  { %2674 = vmatprep.subr.bf16.mxu1 %v2906_v9 }
 0xea3   :  { %2675 = vmatpush3.bf16.msra.mxu1 %v3112_v61 }
 0xea4   :  { %2688 = vmatprep.subr.bf16.mxu1 %v2906_v9 }
 0xf38   :  { %v1504_v47 = vpop.f32.mrf.mxu0 }
 0xf39   :  { %v1505_v48 = vadd.f32 %v3149_v16, %v1504_v47 }
 0xf3a   :  { %v2638_v50 = vpop.f32.mrf.mxu0 }
 0xf3b   :  { %v2270_v6 = vadd.f32 %v1505_v48, %v3307_v52 }
 0xf3c   :  { %v1507_v30 = vpop.f32.mrf.mxu0 }
 0xf3d   :  { %2278 = vst [vmem:[%s3541_s10 + $0x20] sm:$0xff] %v2270_v6 }
 0xf3e   :  { %v2639_v53 = vpop.f32.mrf.mxu0 }
 0xf40   :  { %v1597_v54 = vpop.f32.mrf.mxu0 }
 0xf41   :  { %v1603_v59 = vadd.f32 %v1597_v54, %v3067_v24 }
 0xf42   :  { %v2654_v60 = vpop.f32.mrf.mxu0 }
 0xf43   :  { %2849 = vtanh.f32 %v1603_v59  ;;  %v2354_v12 = vmul.f32 -1.442695, %v1603_v59 }
 0xf44   :  { %v1600_v13 = vpop.f32.mrf.mxu0 }
 0xf46   :  { %v2655_v62 = vpop.f32.mrf.mxu0 }
 0xf50   :  { %v2850_v26 = vpop.eup %2849 }
 0xf51   :  { %1613 = vrot.lane.b32.xlu0 %v2850_v26, %s2909_s4 }
 0xf56   :  { %v1553_v52 = vpop.f32.mrf.mxu1 }
 0xf57   :  { %v2269_v0 = vadd.f32 %v1553_v52, %v1275_v19 }
 0xf58   :  { %v2646_v3 = vpop.f32.mrf.mxu1 }
 0xf59   :  { %2277 = vst [vmem:[%s3541_s10 + $0x18] sm:$0xff] %v2269_v0  ;;  %v1039_v3 = vadd.f32 %v3149_v16, %v3253_v39 }
 0xf5a   :  { %v1556_v5 = vpop.f32.mrf.mxu1 }
 0xf5c   :  { %v2647_v7 = vpop.f32.mrf.mxu1 }
 0xf5e   :  { %v1662_v24 = vpop.f32.mrf.mxu1 }
 0xf5f   :  { %v1668_v18 = vadd.f32 %v1662_v24, %v3056_v10 }
 0xf60   :  { %v2662_v22 = vpop.f32.mrf.mxu1 }
 0xf61   :  { %2851 = vtanh.f32 %v1668_v18  ;;  %v2356_v29 = vmul.f32 -1.442695, %v1668_v18 }
 0xf62   :  { %v1665_v20 = vpop.f32.mrf.mxu1  ;;  %2853 = vpow2.f32 %v2354_v12 }
 0xf64   :  { %v2663_v17 = vpop.f32.mrf.mxu1 }
 0xf6e   :  { %v2852_v21 = vpop.eup %2851 }
 0xf6f   :  { %1678 = vrot.lane.b32.xlu1 %v2852_v21, %s2909_s4  ;;  %v2854_v23 = vpop.eup %2853 }
 0xf70   :  { %v1607_v25 = vadd.f32 1.0, %v2854_v23 }
 0xf72   :  { %2855 = vrcp.f32 %v1607_v25 }
 0xf73   :  { %2857 = vpow2.f32 %v2356_v29 }
 0xf7f   :  { %v2856_v55 = vpop.eup %2855 }
 0xf80   :  { %v2858_v10 = vpop.eup %2857  ;;  %v1611_v1 = vmul.f32 %v2856_v55, %v3314_v34 }
 0xf81   :  { %v1672_v38 = vadd.f32 1.0, %v2858_v10 }
 0xf83   :  { %2859 = vrcp.f32 %v1672_v38 }
 0xf90   :  { %v2860_v11 = vpop.eup %2859 }
 0xf91   :  { %v1676_v8 = vmul.f32 %v2860_v11, %v3319_v51 }
 0xfc3   :  { %v1614_v33 = vpop.permute.xlu0 %1613 }
 0xfc4   :  { %v1616_v35 = vmul.f32 %v2856_v55, %v1614_v33 }
 0xfc6   :  { %1618 = vrot.lane.b32.xlu0 %v1616_v35, %s2910_s21 }
 0xfe1   :  { %v1679_v40 = vpop.permute.xlu1 %1678 }
 0xfe2   :  { %v1681_v41 = vmul.f32 %v2860_v11, %v1679_v40 }
 0xfe4   :  { %1683 = vrot.lane.b32.xlu1 %v1681_v41, %s2910_s21 }
0x1038   :  { %v1619_v42 = vpop.permute.xlu0 %1618 }
0x1039   :  { %v3390_v44 = vadd.f32 %v1619_v42, %v1611_v1 }
0x103b   :  { %2861 = vtanh.f32 %v3390_v44 }
0x1048   :  { %v2862_v2 = vpop.eup %2861 }
0x1049   :  { %1624 = vrot.lane.b32.xlu0 %v2862_v2, %s2909_s4 }
0x1056   :  { %v1684_v14 = vpop.permute.xlu1 %1683 }
0x1057   :  { %v3395_v15 = vadd.f32 %v1684_v14, %v1676_v8 }
0x1059   :  { %2863 = vtanh.f32 %v3395_v15 }
0x1066   :  { %v2864_v47 = vpop.eup %2863 }
0x1067   :  { %1689 = vrot.lane.b32.xlu1 %v2864_v47, %s2909_s4 }
0x10bb   :  { %v1625_v48 = vpop.permute.xlu0 %1624 }
0x10bc   :  { %v1627_v34 = vmul.f32 %v2856_v55, %v1625_v48 }
0x10be   :  { %v1693_v50 = vpack.c.bf16 %v1627_v34, %v1627_v34 }
0x10c0   :  { %1695 = vrot.lane.b32.xlu0 %v1693_v50, %s2910_s21 }
0x10d9   :  { %v1690_v6 = vpop.permute.xlu1 %1689 }
0x10da   :  { %v1692_v30 = vmul.f32 %v2860_v11, %v1690_v6 }
0x10dc   :  { %v1742_v53 = vpack.c.bf16 %v1692_v30, %v1692_v30 }
0x10de   :  { %1744 = vrot.lane.b32.xlu1 %v1742_v53, %s2910_s21 }
0x1132   :  { %v1696_v54 = vpop.permute.xlu0 %1695 }
0x1133   :  { %2669 = vmatmul.mubr.msk.bf16.vlgmr.msra.gmra.mxu0 %vm87_vm0, %v1696_v54 }
0x1134   :  { %2681 = vmatpush3.bf16.msra.mxu0 %v3329_v37  ;;  %2684 = vmatprep.mubr.msk.bf16.mxu0 %vm2908_vm1, %v2906_v9 }
0x1135   :  { %2682 = vmatprep.subr.bf16.mxu0 %v2906_v9 }
0x1138   :  { %2683 = vmatpush3.bf16.msra.mxu0 %v3338_v27 }
0x1139   :  { %2696 = vmatprep.subr.bf16.mxu0 %v2906_v9 }
0x113b   :  { %2685 = vmatmul.mubr.msk.bf16.vlgmr.msra.gmra.mxu0 %vm87_vm0, %v1696_v54  ;;  %v2903_v54 = vld [vmem:[%s3539_s8 + $0x8] sm:$0xff]  }
0x113c   :  { %2697 = vmatpush3.bf16.msra.mxu0 %v3090_v56  ;;  %2700 = vmatprep.mubr.msk.bf16.mxu0 %vm2908_vm1, %v2906_v9 }
0x113d   :  { %2698 = vmatprep.subr.bf16.mxu0 %v2906_v9 }
0x1140   :  { %2699 = vmatpush3.bf16.msra.mxu0 %v3095_v57 }
0x1141   :  { %2712 = vmatprep.subr.bf16.mxu0 %v2906_v9 }
0x1150   :  { %v1745_v51 = vpop.permute.xlu1 %1744 }
0x1151   :  { %2677 = vmatmul.mubr.msk.bf16.vlgmr.msra.gmra.mxu1 %vm87_vm0, %v1745_v51 }
0x1152   :  { %2689 = vmatpush3.bf16.msra.mxu1 %v3353_v45  ;;  %2692 = vmatprep.mubr.msk.bf16.mxu1 %vm2908_vm1, %v2906_v9 }
0x1153   :  { %2690 = vmatprep.subr.bf16.mxu1 %v2906_v9 }
0x1156   :  { %2691 = vmatpush3.bf16.msra.mxu1 %v3362_v46 }
0x1157   :  { %2704 = vmatprep.subr.bf16.mxu1 %v2906_v9 }
0x1159   :  { %2693 = vmatmul.mubr.msk.bf16.vlgmr.msra.gmra.mxu1 %vm87_vm0, %v1745_v51  ;;  %v3494_v51 = vld [vmem:[%s3540_s9] ss:$0 sm:$0xff] }
0x115a   :  { %2705 = vmatpush3.bf16.msra.mxu1 %v3101_v58  ;;  %2708 = vmatprep.mubr.msk.bf16.mxu1 %vm2908_vm1, %v2906_v9 }
0x115b   :  { %2706 = vmatprep.subr.bf16.mxu1 %v2906_v9 }
0x115e   :  { %2707 = vmatpush3.bf16.msra.mxu1 %v3112_v61 }
0x115f   :  { %2720 = vmatprep.subr.bf16.mxu1 %v2906_v9 }
0x11f3   :  { %v1734_v56 = vpop.f32.mrf.mxu0 }
0x11f4   :  { %v1735_v57 = vadd.f32 %v3149_v16, %v1734_v56 }
0x11f5   :  { %v2670_v59 = vpop.f32.mrf.mxu0 }
0x11f6   :  { %v2271_v60 = vadd.f32 %v1735_v57, %v3257_v49 }
0x11f7   :  { %v1737_v13 = vpop.f32.mrf.mxu0 }
0x11f8   :  { %2279 = vst [vmem:[%s3541_s10 + $0x28] sm:$0xff] %v2271_v60 }
0x11f9   :  { %v2671_v58 = vpop.f32.mrf.mxu0 }
0x11fb   :  { %v1827_v62 = vpop.f32.mrf.mxu0 }
0x11fc   :  { %v1833_v26 = vadd.f32 %v1827_v62, %v3071_v28 }
0x11fd   :  { %v2686_v19 = vpop.f32.mrf.mxu0 }
0x11fe   :  { %2865 = vtanh.f32 %v1833_v26  ;;  %v2361_v16 = vmul.f32 -1.442695, %v1833_v26 }
0x11ff   :  { %v1830_v61 = vpop.f32.mrf.mxu0 }
0x1201   :  { %v2687_v52 = vpop.f32.mrf.mxu0 }
0x1202   :  { %v803_v52 = vadd.f32 %v3494_v51, %v3203_v31 }
0x120b   :  { %v2866_v0 = vpop.eup %2865 }
0x120c   :  { %1843 = vrot.lane.b32.xlu0 %v2866_v0, %s2909_s4 }
0x1211   :  { %v1783_v49 = vpop.f32.mrf.mxu1 }
0x1212   :  { %v2268_v5 = vadd.f32 %v1783_v49, %v1039_v3 }
0x1213   :  { %v2678_v7 = vpop.f32.mrf.mxu1 }
0x1214   :  { %2276 = vst [vmem:[%s3541_s10 + $0x10] sm:$0xff] %v2268_v5 }
0x1215   :  { %v1786_v24 = vpop.f32.mrf.mxu1 }
0x1217   :  { %v2679_v18 = vpop.f32.mrf.mxu1 }
0x1219   :  { %v1892_v28 = vpop.f32.mrf.mxu1 }
0x121a   :  { %v1898_v22 = vadd.f32 %v1892_v28, %v3052_v4 }
0x121b   :  { %v2694_v20 = vpop.f32.mrf.mxu1 }
0x121c   :  { %2867 = vtanh.f32 %v1898_v22  ;;  %v2363_v25 = vmul.f32 -1.442695, %v1898_v22 }
0x121d   :  { %v1895_v17 = vpop.f32.mrf.mxu1  ;;  %2869 = vpow2.f32 %v2361_v16 }
0x121f   :  { %v2695_v21 = vpop.f32.mrf.mxu1 }
0x1229   :  { %v2868_v12 = vpop.eup %2867 }
0x122a   :  { %1908 = vrot.lane.b32.xlu1 %v2868_v12, %s2909_s4  ;;  %v2870_v39 = vpop.eup %2869 }
0x122b   :  { %v1837_v23 = vadd.f32 1.0, %v2870_v39 }
0x122d   :  { %2871 = vrcp.f32 %v1837_v23 }
0x122e   :  { %2873 = vpow2.f32 %v2363_v25 }
0x123a   :  { %v2872_v29 = vpop.eup %2871 }
0x123b   :  { %v2874_v4 = vpop.eup %2873  ;;  %v1841_v40 = vmul.f32 %v2872_v29, %v3390_v44 }
0x123c   :  { %v1902_v35 = vadd.f32 1.0, %v2874_v4 }
0x123e   :  { %2875 = vrcp.f32 %v1902_v35 }
0x124b   :  { %v2876_v10 = vpop.eup %2875 }
0x124c   :  { %v1906_v2 = vmul.f32 %v2876_v10, %v3395_v15  ;;  %v2901_v15 = vld [vmem:[%s3538_s7 + $0x8] sm:$0xff]  }
0x127e   :  { %v1844_v55 = vpop.permute.xlu0 %1843 }
0x127f   :  { %v1846_v33 = vmul.f32 %v2872_v29, %v1844_v55 }
0x1281   :  { %1848 = vrot.lane.b32.xlu0 %v1846_v33, %s2910_s21 }
0x129c   :  { %v1909_v38 = vpop.permute.xlu1 %1908 }
0x129d   :  { %v1911_v11 = vmul.f32 %v2876_v10, %v1909_v38 }
0x129f   :  { %1913 = vrot.lane.b32.xlu1 %v1911_v11, %s2910_s21 }
0x12f3   :  { %v1849_v41 = vpop.permute.xlu0 %1848 }
0x12f4   :  { %v3446_v1 = vadd.f32 %v1849_v41, %v1841_v40 }
0x12f6   :  { %2877 = vtanh.f32 %v3446_v1 }
0x1303   :  { %v2878_v42 = vpop.eup %2877 }
0x1304   :  { %1854 = vrot.lane.b32.xlu0 %v2878_v42, %s2909_s4 }
0x1311   :  { %v1914_v8 = vpop.permute.xlu1 %1913 }
0x1312   :  { %v3451_v14 = vadd.f32 %v1914_v8, %v1906_v2 }
0x1314   :  { %2879 = vtanh.f32 %v3451_v14 }
0x1321   :  { %v2880_v47 = vpop.eup %2879 }
0x1322   :  { %1919 = vrot.lane.b32.xlu1 %v2880_v47, %s2909_s4 }
0x1376   :  { %v1855_v48 = vpop.permute.xlu0 %1854 }
0x1377   :  { %v1857_v44 = vmul.f32 %v2872_v29, %v1855_v48 }
0x1379   :  { %v1923_v34 = vpack.c.bf16 %v1857_v44, %v1857_v44 }
0x137b   :  { %1925 = vrot.lane.b32.xlu0 %v1923_v34, %s2910_s21 }
0x1394   :  { %v1920_v50 = vpop.permute.xlu1 %1919 }
0x1395   :  { %v1922_v6 = vmul.f32 %v2876_v10, %v1920_v50 }
0x1397   :  { %v1972_v30 = vpack.c.bf16 %v1922_v6, %v1922_v6 }
0x1399   :  { %1974 = vrot.lane.b32.xlu1 %v1972_v30, %s2910_s21 }
0x13ed   :  { %v1926_v53 = vpop.permute.xlu0 %1925 }
0x13ee   :  { %2701 = vmatmul.mubr.msk.bf16.vlgmr.msra.gmra.mxu0 %vm87_vm0, %v1926_v53 }
0x13ef   :  { %2713 = vmatpush3.bf16.msra.mxu0 %v3329_v37  ;;  %2716 = vmatprep.mubr.msk.bf16.mxu0 %vm2908_vm1, %v2906_v9  ;;  %v2902_v37 = vld [vmem:[%s3538_s7] sm:$0xff]  }
0x13f0   :  { %2714 = vmatprep.subr.bf16.mxu0 %v2906_v9 }
0x13f3   :  { %2715 = vmatpush3.bf16.msra.mxu0 %v3338_v27 }
0x13f4   :  { %2728 = vmatprep.subr.bf16.mxu0 %v2906_v9 }
0x13f6   :  { %2717 = vmatmul.mubr.msk.bf16.vlgmr.msra.gmra.mxu0 %vm87_vm0, %v1926_v53 }
0x13f7   :  { %2729 = vmatpush3.bf16.msra.mxu0 %v2901_v15  ;;  %2732 = vmatprep.mubr.msk.bf16.mxu0 %vm2908_vm1, %v2906_v9 }
0x13f8   :  { %2730 = vmatprep.subr.bf16.mxu0 %v2906_v9 }
0x13fb   :  { %2731 = vmatpush3.bf16.msra.mxu0 %v2902_v37 }
0x140b   :  { %v1975_v27 = vpop.permute.xlu1 %1974 }
0x140c   :  { %2709 = vmatmul.mubr.msk.bf16.vlgmr.msra.gmra.mxu1 %vm87_vm0, %v1975_v27 }
0x140d   :  { %2721 = vmatpush3.bf16.msra.mxu1 %v3353_v45  ;;  %2724 = vmatprep.mubr.msk.bf16.mxu1 %vm2908_vm1, %v2906_v9  ;;  %v2904_v45 = vld [vmem:[%s3539_s8] sm:$0xff]  }
0x140e   :  { %2722 = vmatprep.subr.bf16.mxu1 %v2906_v9 }
0x1411   :  { %2723 = vmatpush3.bf16.msra.mxu1 %v3362_v46 }
0x1412   :  { %2736 = vmatprep.subr.bf16.mxu1 %v2906_v9 }
0x1414   :  { %2725 = vmatmul.mubr.msk.bf16.vlgmr.msra.gmra.mxu1 %vm87_vm0, %v1975_v27  ;;  %v2250_v27 = vld [vmem:[%s3541_s10] sm:$0xff] }
0x1415   :  { %2737 = vmatpush3.bf16.msra.mxu1 %v2903_v54  ;;  %2740 = vmatprep.mubr.msk.bf16.mxu1 %vm2908_vm1, %v2906_v9 }
0x1416   :  { %2738 = vmatprep.subr.bf16.mxu1 %v2906_v9 }
0x1419   :  { %2739 = vmatpush3.bf16.msra.mxu1 %v2904_v45 }
0x14ae   :  { %v1964_v46 = vpop.f32.mrf.mxu0 }
0x14af   :  { %v1965_v56 = vadd.f32 %v3494_v51, %v1964_v46 }
0x14b0   :  { %v2702_v57 = vpop.f32.mrf.mxu0 }
0x14b1   :  { %v2272_v59 = vadd.f32 %v1965_v56, %v3207_v43 }
0x14b2   :  { %v1967_v60 = vpop.f32.mrf.mxu0 }
0x14b3   :  { %2280 = vst [vmem:[%s3541_s10 + $0x30] sm:$0xff] %v2272_v59 }
0x14b4   :  { %v2703_v9 = vpop.f32.mrf.mxu0 }
0x14b6   :  { %v2057_v13 = vpop.f32.mrf.mxu0 }
0x14b7   :  { %v2063_v58 = vadd.f32 %v2057_v13, %v3075_v32 }
0x14b8   :  { %v2718_v62 = vpop.f32.mrf.mxu0 }
0x14b9   :  { %2881 = vtanh.f32 %v2063_v58  ;;  %v2368_v31 = vmul.f32 -1.442695, %v2063_v58 }
0x14ba   :  { %v2060_v26 = vpop.f32.mrf.mxu0 }
0x14bc   :  { %v2719_v19 = vpop.f32.mrf.mxu0 }
0x14c6   :  { %v2882_v61 = vpop.eup %2881 }
0x14c7   :  { %2073 = vrot.lane.b32.xlu0 %v2882_v61, %s2909_s4 }
0x14cc   :  { %v2013_v43 = vpop.f32.mrf.mxu1 }
0x14cd   :  { %v2267_v0 = vadd.f32 %v2013_v43, %v803_v52 }
0x14ce   :  { %v2710_v3 = vpop.f32.mrf.mxu1 }
0x14cf   :  { %2275 = vst [vmem:[%s3541_s10 + $0x8] sm:$0xff] %v2267_v0 }
0x14d0   :  { %v2016_v49 = vpop.f32.mrf.mxu1 }
0x14d2   :  { %v2711_v5 = vpop.f32.mrf.mxu1 }
0x14d4   :  { %v2122_v32 = vpop.f32.mrf.mxu1 }
0x14d5   :  { %v2128_v7 = vadd.f32 %v2122_v32, %v3048_v63 }
0x14d6   :  { %v2726_v24 = vpop.f32.mrf.mxu1 }
0x14d7   :  { %2883 = vtanh.f32 %v2128_v7  ;;  %v2370_v21 = vmul.f32 -1.442695, %v2128_v7 }
0x14d8   :  { %v2125_v18 = vpop.f32.mrf.mxu1  ;;  %2885 = vpow2.f32 %v2368_v31 }
0x14da   :  { %v2727_v28 = vpop.f32.mrf.mxu1 }
0x14e4   :  { %v2884_v22 = vpop.eup %2883 }
0x14e5   :  { %2138 = vrot.lane.b32.xlu1 %v2884_v22, %s2909_s4  ;;  %v2886_v20 = vpop.eup %2885 }
0x14e6   :  { %v2067_v17 = vadd.f32 1.0, %v2886_v20 }
0x14e8   :  { %2887 = vrcp.f32 %v2067_v17 }
0x14e9   :  { %2889 = vpow2.f32 %v2370_v21 }
0x14f5   :  { %v2888_v12 = vpop.eup %2887 }
0x14f6   :  { %v2890_v63 = vpop.eup %2889  ;;  %v2071_v33 = vmul.f32 %v2888_v12, %v3446_v1 }
0x14f7   :  { %v2132_v23 = vadd.f32 1.0, %v2890_v63 }
0x14f9   :  { %2891 = vrcp.f32 %v2132_v23 }
0x1506   :  { %v2892_v25 = vpop.eup %2891 }
0x1507   :  { %v2136_v38 = vmul.f32 %v2892_v25, %v3451_v14 }
0x1539   :  { %v2074_v16 = vpop.permute.xlu0 %2073 }
0x153a   :  { %v2076_v39 = vmul.f32 %v2888_v12, %v2074_v16 }
0x153c   :  { %2078 = vrot.lane.b32.xlu0 %v2076_v39, %s2910_s21 }
0x1557   :  { %v2139_v29 = vpop.permute.xlu1 %2138 }
0x1558   :  { %v2141_v55 = vmul.f32 %v2892_v25, %v2139_v29 }
0x155a   :  { %2143 = vrot.lane.b32.xlu1 %v2141_v55, %s2910_s21 }
0x15ae   :  { %v2079_v4 = vpop.permute.xlu0 %2078 }
0x15af   :  { %v2081_v35 = vadd.f32 %v2079_v4, %v2071_v33 }
0x15b1   :  { %2893 = vtanh.f32 %v2081_v35 }
0x15be   :  { %v2894_v10 = vpop.eup %2893 }
0x15bf   :  { %2084 = vrot.lane.b32.xlu0 %v2894_v10, %s2909_s4 }
0x15cc   :  { %v2144_v11 = vpop.permute.xlu1 %2143 }
0x15cd   :  { %v2146_v40 = vadd.f32 %v2144_v11, %v2136_v38 }
0x15cf   :  { %2895 = vtanh.f32 %v2146_v40 }
0x15dc   :  { %v2896_v41 = vpop.eup %2895 }
0x15dd   :  { %2149 = vrot.lane.b32.xlu1 %v2896_v41, %s2909_s4 }
0x1631   :  { %v2085_v42 = vpop.permute.xlu0 %2084 }
0x1632   :  { %v2087_v2 = vmul.f32 %v2888_v12, %v2085_v42 }
0x1634   :  { %v2153_v8 = vpack.c.bf16 %v2087_v2, %v2087_v2 }
0x1636   :  { %2155 = vrot.lane.b32.xlu0 %v2153_v8, %s2910_s21 }
0x164f   :  { %v2150_v1 = vpop.permute.xlu1 %2149 }
0x1650   :  { %v2152_v47 = vmul.f32 %v2892_v25, %v2150_v1 }
0x1652   :  { %v2202_v48 = vpack.c.bf16 %v2152_v47, %v2152_v47 }
0x1654   :  { %2204 = vrot.lane.b32.xlu1 %v2202_v48, %s2910_s21 }
0x16a8   :  { %v2156_v44 = vpop.permute.xlu0 %2155 }
0x16a9   :  { %2733 = vmatmul.mubr.msk.bf16.vlgmr.msra.gmra.mxu0 %vm87_vm0, %v2156_v44 }
0x16c6   :  { %v2205_v14 = vpop.permute.xlu1 %2204 }
0x16c7   :  { %2741 = vmatmul.mubr.msk.bf16.vlgmr.msra.gmra.mxu1 %vm87_vm0, %v2205_v14 }
0x1769   :  { %v2194_v34 = vpop.f32.mrf.mxu0 }
0x176a   :  { %v2195_v50 = vadd.f32 %v3494_v51, %v2194_v34 }
0x176b   :  { %v2734_v6 = vpop.f32.mrf.mxu0 }
0x176c   :  { %v2273_v30 = vadd.f32 %v2195_v50, %v3157_v36 }
0x176d   :  { %v2197_v53 = vpop.f32.mrf.mxu0 }
0x176e   :  { %2281 = vst [vmem:[%s3541_s10 + $0x38] sm:$0xff] %v2273_v30 }
0x176f   :  { %v2735_v15 = vpop.f32.mrf.mxu0 }
0x1787   :  { %v2243_v37 = vpop.f32.mrf.mxu1 }
0x1788   :  { %v2266_v54 = vadd.f32 %v2250_v27, %v2243_v37 }
0x1789   :  { %v2742_v45 = vpop.f32.mrf.mxu1 }
0x178a   :  { %2274 = vst [vmem:[%s3541_s10] sm:$0xff] %v2266_v54 }
0x178b   :  { %v2246_v46 = vpop.f32.mrf.mxu1 }
0x178d   :  { %v2743_v51 = vpop.f32.mrf.mxu1 }

</bundles_post_ra>
